<compile_context>
chip_gen: v7x
topology: tpu7x:2x2x1
jax: 0.10.0
libtpu: 0.0.40
codegen_flags: <defaults>
</compile_context>

<pallas_src>
import numpy as np
import jax
import jax.numpy as jnp
from jax.experimental import pallas as pl
from jax.experimental.pallas import tpu as pltpu

LN_EPS = 1e-5


def _make_dense_block_kernel(T, F, C, depth):
    L = F * C                      # fused freq*channel lane axis (= 128 here)
    max_dil = 2 ** (depth - 1)

    def kernel(*refs):
        x_ref = refs[0]
        avg_ref = refs[1]
        p = refs[2:2 + 6 * depth]
        o_ref = refs[2 + 6 * depth]
        skip_ref = refs[3 + 6 * depth]          # VMEM (T+max_dil, depth*L)

        # Zero only the causal pad rows (interior rows are always fully
        # rewritten before being read, so no full-scratch memset is needed).
        skip_ref[0:max_dil, :] = jnp.zeros((max_dil, depth * L), jnp.float32)
        # Lane group 0 <- x.
        skip_ref[max_dil:max_dil + T, 0:L] = x_ref[...]

        avg = avg_ref[...]                      # (L, L) LN-over-F averaging matrix
        out = None
        for i in range(depth):
            w0, w1, b_row, lnw_row, lnb_row, a_row = p[6 * i:6 * i + 6]
            dil = 2 ** i
            K = (i + 1) * L

            # Dilated (2,3) conv == two lane-dense matmuls: freq taps + freq
            # zero-pad are folded into the banded weights, time taps are row
            # slices of the causal-padded scratch.
            a0 = skip_ref[max_dil - dil:max_dil - dil + T, 0:K]   # rows t - dil
            a1 = skip_ref[max_dil:max_dil + T, 0:K]               # rows t
            y = (jnp.dot(a0, w0[...], preferred_element_type=jnp.float32)
                 + jnp.dot(a1, w1[...], preferred_element_type=jnp.float32)
                 + b_row[...])

            # LayerNorm over F (biased variance) with the F-reduction on the MXU.
            mean = jnp.dot(y, avg, preferred_element_type=jnp.float32)
            d = y - mean
            var = jnp.dot(d * d, avg, preferred_element_type=jnp.float32)
            yn = d * jax.lax.rsqrt(var + LN_EPS)
            yn = yn * lnw_row[...] + lnb_row[...]

            # PReLU with per-channel slope (pre-tiled to L lanes).
            out = jnp.where(yn >= 0.0, yn, a_row[...] * yn)

            # Single deposit into the next lane group (skip = cat([out, skip])).
            if i + 1 < depth:
                skip_ref[max_dil:max_dil + T, (i + 1) * L:(i + 2) * L] = out

        o_ref[...] = out

    return kernel


def _banded_weights(w, i, F, C):
    """Fold freq taps + (1,1) freq zero-pad into two ((i+1)*F*C, F*C) weights.

    Lane ordering of the activation is lane = f*C + c; lane group g of the
    conv input is: g == 0 -> x, g >= 1 -> out_{g-1}, matching PyTorch's
    cat([out_{i-1}, ..., out_0, x]) via block j = i - g of the torch weight.
    """
    L = F * C
    shifts = []
    for df in (-1, 0, 1):
        S = np.zeros((F, F), np.float32)
        for fo in range(F):
            fi = fo + df
            if 0 <= fi < F:
                S[fi, fo] = 1.0
        shifts.append(jnp.asarray(S))

    taps = []
    for kt in range(2):
        blocks = []
        for g in range(i + 1):
            j = i - g
            wg = jnp.zeros((L, L), jnp.float32)
            for df in (-1, 0, 1):
                blk = w[kt, df + 1, j * C:(j + 1) * C, :]          # (C, C)
                wg = wg + jnp.kron(shifts[df + 1], blk)
            blocks.append(wg)
        taps.append(jnp.concatenate(blocks, axis=0))               # ((i+1)*L, L)
    return taps


def dense_block_forward(x_nchw, params, depth, in_channels):
    """Fused Pallas DenseBlock forward.  Input/output NCHW = (B, C, T, F)."""
    B, C, T, F = x_nchw.shape
    assert C == in_channels
    L = F * C
    max_dil = 2 ** (depth - 1)

    # Lane-dense activation layout: (B, T, F*C), lane = f*C + c.
    x = jnp.transpose(x_nchw, (0, 2, 3, 1)).reshape(B, T, L)

    # Constant LayerNorm-over-F averaging matrix (per-channel block structure).
    avg = jnp.asarray(np.kron(np.full((F, F), 1.0 / F, np.float32),
                              np.eye(C, dtype=np.float32)))

    inputs = [x, avg]
    in_specs = [
        pl.BlockSpec((None, T, L), lambda b: (b, 0, 0)),
        pl.BlockSpec((L, L), lambda b: (0, 0)),
    ]
    for i in range(depth):
        p = params[i]
        w0, w1 = _banded_weights(p["w"], i, F, C)
        b_row = jnp.tile(p["b"], (F,)).reshape(1, L)        # bias[c] at lane f*C+c
        lnw_row = jnp.repeat(p["ln_w"], C).reshape(1, L)    # ln_w[f] at lane f*C+c
        lnb_row = jnp.repeat(p["ln_b"], C).reshape(1, L)
        a_row = jnp.tile(p["alpha"], (F,)).reshape(1, L)    # alpha[c] at lane f*C+c
        inputs += [w0, w1, b_row, lnw_row, lnb_row, a_row]
        Ki = (i + 1) * L
        in_specs += [
            pl.BlockSpec((Ki, L), lambda b: (0, 0)),
            pl.BlockSpec((Ki, L), lambda b: (0, 0)),
            pl.BlockSpec((1, L), lambda b: (0, 0)),
            pl.BlockSpec((1, L), lambda b: (0, 0)),
            pl.BlockSpec((1, L), lambda b: (0, 0)),
            pl.BlockSpec((1, L), lambda b: (0, 0)),
        ]

    kernel = _make_dense_block_kernel(T, F, C, depth)
    out = pl.pallas_call(
        kernel,
        out_shape=jax.ShapeDtypeStruct((B, T, L), jnp.float32),
        grid=(B,),
        in_specs=in_specs,
        out_specs=pl.BlockSpec((None, T, L), lambda b: (b, 0, 0)),
        scratch_shapes=[pltpu.VMEM((T + max_dil, depth * L), jnp.float32)],
        compiler_params=pltpu.CompilerParams(
            dimension_semantics=("parallel",),
        ),
    )(*inputs)
    return jnp.transpose(out.reshape(B, T, F, C), (0, 3, 1, 2))   # back to NCHW


def reference_forward(x_nchw, params, depth, in_channels):
    """Pure-JAX reference (lax.conv) mirroring the PyTorch forward."""
    x = jnp.transpose(x_nchw, (0, 2, 3, 1))
    skip = x
    out = None
    for i in range(depth):
        dil = 2 ** i
        xp = jnp.pad(skip, ((0, 0), (dil, 0), (1, 1), (0, 0)))
        p = params[i]
        y = jax.lax.conv_general_dilated(
            xp, p["w"], window_strides=(1, 1), padding="VALID",
            rhs_dilation=(dil, 1),
            dimension_numbers=("NHWC", "HWIO", "NHWC"),
        ) + p["b"][None, None, None, :]
        mean = jnp.mean(y, axis=2, keepdims=True)
        var = jnp.mean((y - mean) ** 2, axis=2, keepdims=True)
        yn = (y - mean) / jnp.sqrt(var + LN_EPS)
        yn = yn * p["ln_w"][None, None, :, None] + p["ln_b"][None, None, :, None]
        out = jnp.where(yn >= 0.0, yn, p["alpha"][None, None, None, :] * yn)
        skip = jnp.concatenate([out, skip], axis=-1)
    return jnp.transpose(out, (0, 3, 1, 2))


def init_params(key, depth, in_channels, input_size):
    params = []
    for i in range(depth):
        C_in = in_channels * (i + 1)
        key, k1, k2, k3, k4, k5 = jax.random.split(key, 6)
        params.append(dict(
            w=0.1 * jax.random.normal(k1, (2, 3, C_in, in_channels), jnp.float32),
            b=0.1 * jax.random.normal(k2, (in_channels,), jnp.float32),
            ln_w=1.0 + 0.1 * jax.random.normal(k3, (input_size,), jnp.float32),
            ln_b=0.1 * jax.random.normal(k4, (input_size,), jnp.float32),
            alpha=0.25 + 0.05 * jax.random.normal(k5, (in_channels,), jnp.float32),
        ))
    return params


if __name__ == "__main__":
    # NCHW input (batch, in_channels, time, input_size); F * C = 128.
    B, C, T, F = 2, 8, 8, 16
    depth = 3

    key = jax.random.PRNGKey(0)
    kx, kp = jax.random.split(key)
    x = jax.random.normal(kx, (B, C, T, F), jnp.float32)
    params = init_params(kp, depth, C, F)

    out = jax.block_until_ready(dense_block_forward(x, params, depth, C))
    ref = jax.block_until_ready(reference_forward(x, params, depth, C))

    if out.shape != (B, C, T, F):
        raise AssertionError(f"bad output shape {out.shape}")
    max_err = float(jnp.max(jnp.abs(out - ref)))
    if max_err > 1e-3:
        raise AssertionError(f"mismatch vs reference, max abs err = {max_err}")
    print("KERNEL_OK")
</pallas_src>

<mosaic_0001>
module attributes {stable_mosaic.version = 11 : i64} {
  func.func @kernel(%arg0: i32, %arg1: memref<1x8x128xf32, #tpu.memory_space<vmem>>, %arg2: memref<128x128xf32, #tpu.memory_space<vmem>>, %arg3: memref<128x128xf32, #tpu.memory_space<vmem>>, %arg4: memref<128x128xf32, #tpu.memory_space<vmem>>, %arg5: memref<1x128xf32, #tpu.memory_space<vmem>>, %arg6: memref<1x128xf32, #tpu.memory_space<vmem>>, %arg7: memref<1x128xf32, #tpu.memory_space<vmem>>, %arg8: memref<1x128xf32, #tpu.memory_space<vmem>>, %arg9: memref<256x128xf32, #tpu.memory_space<vmem>>, %arg10: memref<256x128xf32, #tpu.memory_space<vmem>>, %arg11: memref<1x128xf32, #tpu.memory_space<vmem>>, %arg12: memref<1x128xf32, #tpu.memory_space<vmem>>, %arg13: memref<1x128xf32, #tpu.memory_space<vmem>>, %arg14: memref<1x128xf32, #tpu.memory_space<vmem>>, %arg15: memref<384x128xf32, #tpu.memory_space<vmem>>, %arg16: memref<384x128xf32, #tpu.memory_space<vmem>>, %arg17: memref<1x128xf32, #tpu.memory_space<vmem>>, %arg18: memref<1x128xf32, #tpu.memory_space<vmem>>, %arg19: memref<1x128xf32, #tpu.memory_space<vmem>>, %arg20: memref<1x128xf32, #tpu.memory_space<vmem>>, %arg21: memref<1x8x128xf32, #tpu.memory_space<vmem>>, %arg22: memref<12x384xf32, #tpu.memory_space<vmem>>) attributes {dimension_semantics = [#tpu.dimension_semantics<parallel>], iteration_bounds = array<i64: 2>, scalar_prefetch = 0 : i64, scratch_operands = 1 : i64, tpu.core_type = #tpu.core_type<tc>, window_params = [{transform_indices = @transform_0, window_bounds = array<i64: 1, 8, 128>}, {pipeline_mode = #tpu.pipeline_mode<synchronous>, transform_indices = @transform_1, window_bounds = array<i64: 128, 128>}, {pipeline_mode = #tpu.pipeline_mode<synchronous>, transform_indices = @transform_2, window_bounds = array<i64: 128, 128>}, {pipeline_mode = #tpu.pipeline_mode<synchronous>, transform_indices = @transform_3, window_bounds = array<i64: 128, 128>}, {pipeline_mode = #tpu.pipeline_mode<synchronous>, transform_indices = @transform_4, window_bounds = array<i64: 1, 128>}, {pipeline_mode = #tpu.pipeline_mode<synchronous>, transform_indices = @transform_5, window_bounds = array<i64: 1, 128>}, {pipeline_mode = #tpu.pipeline_mode<synchronous>, transform_indices = @transform_6, window_bounds = array<i64: 1, 128>}, {pipeline_mode = #tpu.pipeline_mode<synchronous>, transform_indices = @transform_7, window_bounds = array<i64: 1, 128>}, {pipeline_mode = #tpu.pipeline_mode<synchronous>, transform_indices = @transform_8, window_bounds = array<i64: 256, 128>}, {pipeline_mode = #tpu.pipeline_mode<synchronous>, transform_indices = @transform_9, window_bounds = array<i64: 256, 128>}, {pipeline_mode = #tpu.pipeline_mode<synchronous>, transform_indices = @transform_10, window_bounds = array<i64: 1, 128>}, {pipeline_mode = #tpu.pipeline_mode<synchronous>, transform_indices = @transform_11, window_bounds = array<i64: 1, 128>}, {pipeline_mode = #tpu.pipeline_mode<synchronous>, transform_indices = @transform_12, window_bounds = array<i64: 1, 128>}, {pipeline_mode = #tpu.pipeline_mode<synchronous>, transform_indices = @transform_13, window_bounds = array<i64: 1, 128>}, {pipeline_mode = #tpu.pipeline_mode<synchronous>, transform_indices = @transform_14, window_bounds = array<i64: 384, 128>}, {pipeline_mode = #tpu.pipeline_mode<synchronous>, transform_indices = @transform_15, window_bounds = array<i64: 384, 128>}, {pipeline_mode = #tpu.pipeline_mode<synchronous>, transform_indices = @transform_16, window_bounds = array<i64: 1, 128>}, {pipeline_mode = #tpu.pipeline_mode<synchronous>, transform_indices = @transform_17, window_bounds = array<i64: 1, 128>}, {pipeline_mode = #tpu.pipeline_mode<synchronous>, transform_indices = @transform_18, window_bounds = array<i64: 1, 128>}, {pipeline_mode = #tpu.pipeline_mode<synchronous>, transform_indices = @transform_19, window_bounds = array<i64: 1, 128>}, {transform_indices = @transform_20, window_bounds = array<i64: 1, 8, 128>}]} {
    %cst = arith.constant 0.000000e+00 : f32
    %0 = vector.broadcast %cst : f32 to vector<4x384xf32>
    %c0 = arith.constant 0 : index
    %c0_0 = arith.constant 0 : index
    %1 = vector.load %arg22[%c0, %c0_0] : memref<12x384xf32, #tpu.memory_space<vmem>>, vector<4x384xf32>
    tpu.vector_store %arg22[%c0, %c0_0], %0 {strides = array<i32>} : memref<12x384xf32, #tpu.memory_space<vmem>>, vector<4x384xf32>,
    %c0_1 = arith.constant 0 : index
    %c0_2 = arith.constant 0 : index
    %c0_3 = arith.constant 0 : index
    %2 = vector.load %arg1[%c0_1, %c0_2, %c0_3] : memref<1x8x128xf32, #tpu.memory_space<vmem>>, vector<1x8x128xf32>
    %3 = vector.shape_cast %2 : vector<1x8x128xf32> to vector<8x128xf32>
    %c4 = arith.constant 4 : index
    %c0_4 = arith.constant 0 : index
    %4 = vector.load %arg22[%c4, %c0_4] : memref<12x384xf32, #tpu.memory_space<vmem>>, vector<8x128xf32>
    tpu.vector_store %arg22[%c4, %c0_4], %3 {strides = array<i32>} : memref<12x384xf32, #tpu.memory_space<vmem>>, vector<8x128xf32>,
    %c0_5 = arith.constant 0 : index
    %c0_6 = arith.constant 0 : index
    %5 = vector.load %arg2[%c0_5, %c0_6] : memref<128x128xf32, #tpu.memory_space<vmem>>, vector<128x128xf32>
    %c3 = arith.constant 3 : index
    %c0_7 = arith.constant 0 : index
    %6 = vector.load %arg22[%c3, %c0_7] : memref<12x384xf32, #tpu.memory_space<vmem>>, vector<8x128xf32>
    %c4_8 = arith.constant 4 : index
    %c0_9 = arith.constant 0 : index
    %7 = vector.load %arg22[%c4_8, %c0_9] : memref<12x384xf32, #tpu.memory_space<vmem>>, vector<8x128xf32>
    %c0_10 = arith.constant 0 : index
    %c0_11 = arith.constant 0 : index
    %8 = vector.load %arg3[%c0_10, %c0_11] : memref<128x128xf32, #tpu.memory_space<vmem>>, vector<128x128xf32>
    %cst_12 = arith.constant dense<0.000000e+00> : vector<8x128xf32>
    %9 = tpu.matmul %6, %8, %cst_12 {dimension_numbers = #tpu.dot_dimension_numbers<[1], [0], [0], [1], [0, 0, 1, 1], [], []>} : vector<8x128xf32>, vector<128x128xf32>, vector<8x128xf32> -> vector<8x128xf32>
    %c0_13 = arith.constant 0 : index
    %c0_14 = arith.constant 0 : index
    %10 = vector.load %arg4[%c0_13, %c0_14] : memref<128x128xf32, #tpu.memory_space<vmem>>, vector<128x128xf32>
    %cst_15 = arith.constant dense<0.000000e+00> : vector<8x128xf32>
    %11 = tpu.matmul %7, %10, %cst_15 {dimension_numbers = #tpu.dot_dimension_numbers<[1], [0], [0], [1], [0, 0, 1, 1], [], []>} : vector<8x128xf32>, vector<128x128xf32>, vector<8x128xf32> -> vector<8x128xf32>
    %12 = arith.addf %9, %11 : vector<8x128xf32>
    %c0_16 = arith.constant 0 : index
    %c0_17 = arith.constant 0 : index
    %13 = vector.load %arg5[%c0_16, %c0_17] : memref<1x128xf32, #tpu.memory_space<vmem>>, vector<1x128xf32>
    %14 = vector.broadcast %13 : vector<1x128xf32> to vector<8x128xf32>
    %15 = arith.addf %12, %14 : vector<8x128xf32>
    %cst_18 = arith.constant dense<0.000000e+00> : vector<8x128xf32>
    %16 = tpu.matmul %15, %5, %cst_18 {dimension_numbers = #tpu.dot_dimension_numbers<[1], [0], [0], [1], [0, 0, 1, 1], [], []>} : vector<8x128xf32>, vector<128x128xf32>, vector<8x128xf32> -> vector<8x128xf32>
    %17 = arith.subf %15, %16 : vector<8x128xf32>
    %18 = arith.mulf %17, %17 : vector<8x128xf32>
    %cst_19 = arith.constant dense<0.000000e+00> : vector<8x128xf32>
    %19 = tpu.matmul %18, %5, %cst_19 {dimension_numbers = #tpu.dot_dimension_numbers<[1], [0], [0], [1], [0, 0, 1, 1], [], []>} : vector<8x128xf32>, vector<128x128xf32>, vector<8x128xf32> -> vector<8x128xf32>
    %cst_20 = arith.constant 9.99999974E-6 : f32
    %20 = vector.broadcast %cst_20 : f32 to vector<8x128xf32>
    %21 = arith.addf %19, %20 : vector<8x128xf32>
    %22 = math.rsqrt %21 : vector<8x128xf32>
    %23 = arith.mulf %17, %22 : vector<8x128xf32>
    %c0_21 = arith.constant 0 : index
    %c0_22 = arith.constant 0 : index
    %24 = vector.load %arg6[%c0_21, %c0_22] : memref<1x128xf32, #tpu.memory_space<vmem>>, vector<1x128xf32>
    %25 = vector.broadcast %24 : vector<1x128xf32> to vector<8x128xf32>
    %26 = arith.mulf %23, %25 : vector<8x128xf32>
    %c0_23 = arith.constant 0 : index
    %c0_24 = arith.constant 0 : index
    %27 = vector.load %arg7[%c0_23, %c0_24] : memref<1x128xf32, #tpu.memory_space<vmem>>, vector<1x128xf32>
    %28 = vector.broadcast %27 : vector<1x128xf32> to vector<8x128xf32>
    %29 = arith.addf %26, %28 : vector<8x128xf32>
    %cst_25 = arith.constant 0.000000e+00 : f32
    %30 = vector.broadcast %cst_25 : f32 to vector<8x128xf32>
    %31 = arith.cmpf oge, %29, %30 : vector<8x128xf32>
    %c0_26 = arith.constant 0 : index
    %c0_27 = arith.constant 0 : index
    %32 = vector.load %arg8[%c0_26, %c0_27] : memref<1x128xf32, #tpu.memory_space<vmem>>, vector<1x128xf32>
    %33 = vector.broadcast %32 : vector<1x128xf32> to vector<8x128xf32>
    %34 = arith.mulf %33, %29 : vector<8x128xf32>
    %35 = arith.select %31, %29, %34 : vector<8x128xi1>, vector<8x128xf32>
    %c4_28 = arith.constant 4 : index
    %c128 = arith.constant 128 : index
    %36 = vector.load %arg22[%c4_28, %c128] : memref<12x384xf32, #tpu.memory_space<vmem>>, vector<8x128xf32>
    tpu.vector_store %arg22[%c4_28, %c128], %35 {strides = array<i32>} : memref<12x384xf32, #tpu.memory_space<vmem>>, vector<8x128xf32>,
    %c2 = arith.constant 2 : index
    %c0_29 = arith.constant 0 : index
    %37 = vector.load %arg22[%c2, %c0_29] : memref<12x384xf32, #tpu.memory_space<vmem>>, vector<8x256xf32>
    %c4_30 = arith.constant 4 : index
    %c0_31 = arith.constant 0 : index
    %38 = vector.load %arg22[%c4_30, %c0_31] : memref<12x384xf32, #tpu.memory_space<vmem>>, vector<8x256xf32>
    %c0_32 = arith.constant 0 : index
    %c0_33 = arith.constant 0 : index
    %39 = vector.load %arg9[%c0_32, %c0_33] : memref<256x128xf32, #tpu.memory_space<vmem>>, vector<256x128xf32>
    %cst_34 = arith.constant dense<0.000000e+00> : vector<8x128xf32>
    %40 = tpu.matmul %37, %39, %cst_34 {dimension_numbers = #tpu.dot_dimension_numbers<[1], [0], [0], [1], [0, 0, 1, 1], [], []>} : vector<8x256xf32>, vector<256x128xf32>, vector<8x128xf32> -> vector<8x128xf32>
    %c0_35 = arith.constant 0 : index
    %c0_36 = arith.constant 0 : index
    %41 = vector.load %arg10[%c0_35, %c0_36] : memref<256x128xf32, #tpu.memory_space<vmem>>, vector<256x128xf32>
    %cst_37 = arith.constant dense<0.000000e+00> : vector<8x128xf32>
    %42 = tpu.matmul %38, %41, %cst_37 {dimension_numbers = #tpu.dot_dimension_numbers<[1], [0], [0], [1], [0, 0, 1, 1], [], []>} : vector<8x256xf32>, vector<256x128xf32>, vector<8x128xf32> -> vector<8x128xf32>
    %43 = arith.addf %40, %42 : vector<8x128xf32>
    %c0_38 = arith.constant 0 : index
    %c0_39 = arith.constant 0 : index
    %44 = vector.load %arg11[%c0_38, %c0_39] : memref<1x128xf32, #tpu.memory_space<vmem>>, vector<1x128xf32>
    %45 = vector.broadcast %44 : vector<1x128xf32> to vector<8x128xf32>
    %46 = arith.addf %43, %45 : vector<8x128xf32>
    %cst_40 = arith.constant dense<0.000000e+00> : vector<8x128xf32>
    %47 = tpu.matmul %46, %5, %cst_40 {dimension_numbers = #tpu.dot_dimension_numbers<[1], [0], [0], [1], [0, 0, 1, 1], [], []>} : vector<8x128xf32>, vector<128x128xf32>, vector<8x128xf32> -> vector<8x128xf32>
    %48 = arith.subf %46, %47 : vector<8x128xf32>
    %49 = arith.mulf %48, %48 : vector<8x128xf32>
    %cst_41 = arith.constant dense<0.000000e+00> : vector<8x128xf32>
    %50 = tpu.matmul %49, %5, %cst_41 {dimension_numbers = #tpu.dot_dimension_numbers<[1], [0], [0], [1], [0, 0, 1, 1], [], []>} : vector<8x128xf32>, vector<128x128xf32>, vector<8x128xf32> -> vector<8x128xf32>
    %cst_42 = arith.constant 9.99999974E-6 : f32
    %51 = vector.broadcast %cst_42 : f32 to vector<8x128xf32>
    %52 = arith.addf %50, %51 : vector<8x128xf32>
    %53 = math.rsqrt %52 : vector<8x128xf32>
    %54 = arith.mulf %48, %53 : vector<8x128xf32>
    %c0_43 = arith.constant 0 : index
    %c0_44 = arith.constant 0 : index
    %55 = vector.load %arg12[%c0_43, %c0_44] : memref<1x128xf32, #tpu.memory_space<vmem>>, vector<1x128xf32>
    %56 = vector.broadcast %55 : vector<1x128xf32> to vector<8x128xf32>
    %57 = arith.mulf %54, %56 : vector<8x128xf32>
    %c0_45 = arith.constant 0 : index
    %c0_46 = arith.constant 0 : index
    %58 = vector.load %arg13[%c0_45, %c0_46] : memref<1x128xf32, #tpu.memory_space<vmem>>, vector<1x128xf32>
    %59 = vector.broadcast %58 : vector<1x128xf32> to vector<8x128xf32>
    %60 = arith.addf %57, %59 : vector<8x128xf32>
    %cst_47 = arith.constant 0.000000e+00 : f32
    %61 = vector.broadcast %cst_47 : f32 to vector<8x128xf32>
    %62 = arith.cmpf oge, %60, %61 : vector<8x128xf32>
    %c0_48 = arith.constant 0 : index
    %c0_49 = arith.constant 0 : index
    %63 = vector.load %arg14[%c0_48, %c0_49] : memref<1x128xf32, #tpu.memory_space<vmem>>, vector<1x128xf32>
    %64 = vector.broadcast %63 : vector<1x128xf32> to vector<8x128xf32>
    %65 = arith.mulf %64, %60 : vector<8x128xf32>
    %66 = arith.select %62, %60, %65 : vector<8x128xi1>, vector<8x128xf32>
    %c4_50 = arith.constant 4 : index
    %c256 = arith.constant 256 : index
    %67 = vector.load %arg22[%c4_50, %c256] : memref<12x384xf32, #tpu.memory_space<vmem>>, vector<8x128xf32>
    tpu.vector_store %arg22[%c4_50, %c256], %66 {strides = array<i32>} : memref<12x384xf32, #tpu.memory_space<vmem>>, vector<8x128xf32>,
    %c0_51 = arith.constant 0 : index
    %c0_52 = arith.constant 0 : index
    %68 = vector.load %arg22[%c0_51, %c0_52] : memref<12x384xf32, #tpu.memory_space<vmem>>, vector<8x384xf32>
    %c4_53 = arith.constant 4 : index
    %c0_54 = arith.constant 0 : index
    %69 = vector.load %arg22[%c4_53, %c0_54] : memref<12x384xf32, #tpu.memory_space<vmem>>, vector<8x384xf32>
    %c0_55 = arith.constant 0 : index
    %c0_56 = arith.constant 0 : index
    %70 = vector.load %arg15[%c0_55, %c0_56] : memref<384x128xf32, #tpu.memory_space<vmem>>, vector<384x128xf32>
    %cst_57 = arith.constant dense<0.000000e+00> : vector<8x128xf32>
    %71 = tpu.matmul %68, %70, %cst_57 {dimension_numbers = #tpu.dot_dimension_numbers<[1], [0], [0], [1], [0, 0, 1, 1], [], []>} : vector<8x384xf32>, vector<384x128xf32>, vector<8x128xf32> -> vector<8x128xf32>
    %c0_58 = arith.constant 0 : index
    %c0_59 = arith.constant 0 : index
    %72 = vector.load %arg16[%c0_58, %c0_59] : memref<384x128xf32, #tpu.memory_space<vmem>>, vector<384x128xf32>
    %cst_60 = arith.constant dense<0.000000e+00> : vector<8x128xf32>
    %73 = tpu.matmul %69, %72, %cst_60 {dimension_numbers = #tpu.dot_dimension_numbers<[1], [0], [0], [1], [0, 0, 1, 1], [], []>} : vector<8x384xf32>, vector<384x128xf32>, vector<8x128xf32> -> vector<8x128xf32>
    %74 = arith.addf %71, %73 : vector<8x128xf32>
    %c0_61 = arith.constant 0 : index
    %c0_62 = arith.constant 0 : index
    %75 = vector.load %arg17[%c0_61, %c0_62] : memref<1x128xf32, #tpu.memory_space<vmem>>, vector<1x128xf32>
    %76 = vector.broadcast %75 : vector<1x128xf32> to vector<8x128xf32>
    %77 = arith.addf %74, %76 : vector<8x128xf32>
    %cst_63 = arith.constant dense<0.000000e+00> : vector<8x128xf32>
    %78 = tpu.matmul %77, %5, %cst_63 {dimension_numbers = #tpu.dot_dimension_numbers<[1], [0], [0], [1], [0, 0, 1, 1], [], []>} : vector<8x128xf32>, vector<128x128xf32>, vector<8x128xf32> -> vector<8x128xf32>
    %79 = arith.subf %77, %78 : vector<8x128xf32>
    %80 = arith.mulf %79, %79 : vector<8x128xf32>
    %cst_64 = arith.constant dense<0.000000e+00> : vector<8x128xf32>
    %81 = tpu.matmul %80, %5, %cst_64 {dimension_numbers = #tpu.dot_dimension_numbers<[1], [0], [0], [1], [0, 0, 1, 1], [], []>} : vector<8x128xf32>, vector<128x128xf32>, vector<8x128xf32> -> vector<8x128xf32>
    %cst_65 = arith.constant 9.99999974E-6 : f32
    %82 = vector.broadcast %cst_65 : f32 to vector<8x128xf32>
    %83 = arith.addf %81, %82 : vector<8x128xf32>
    %84 = math.rsqrt %83 : vector<8x128xf32>
    %85 = arith.mulf %79, %84 : vector<8x128xf32>
    %c0_66 = arith.constant 0 : index
    %c0_67 = arith.constant 0 : index
    %86 = vector.load %arg18[%c0_66, %c0_67] : memref<1x128xf32, #tpu.memory_space<vmem>>, vector<1x128xf32>
    %87 = vector.broadcast %86 : vector<1x128xf32> to vector<8x128xf32>
    %88 = arith.mulf %85, %87 : vector<8x128xf32>
    %c0_68 = arith.constant 0 : index
    %c0_69 = arith.constant 0 : index
    %89 = vector.load %arg19[%c0_68, %c0_69] : memref<1x128xf32, #tpu.memory_space<vmem>>, vector<1x128xf32>
    %90 = vector.broadcast %89 : vector<1x128xf32> to vector<8x128xf32>
    %91 = arith.addf %88, %90 : vector<8x128xf32>
    %cst_70 = arith.constant 0.000000e+00 : f32
    %92 = vector.broadcast %cst_70 : f32 to vector<8x128xf32>
    %93 = arith.cmpf oge, %91, %92 : vector<8x128xf32>
    %c0_71 = arith.constant 0 : index
    %c0_72 = arith.constant 0 : index
    %94 = vector.load %arg20[%c0_71, %c0_72] : memref<1x128xf32, #tpu.memory_space<vmem>>, vector<1x128xf32>
    %95 = vector.broadcast %94 : vector<1x128xf32> to vector<8x128xf32>
    %96 = arith.mulf %95, %91 : vector<8x128xf32>
    %97 = arith.select %93, %91, %96 : vector<8x128xi1>, vector<8x128xf32>
    %c0_73 = arith.constant 0 : index
    %c0_74 = arith.constant 0 : index
    %c0_75 = arith.constant 0 : index
    %98 = vector.load %arg21[%c0_73, %c0_74, %c0_75] : memref<1x8x128xf32, #tpu.memory_space<vmem>>, vector<1x8x128xf32>
    %99 = vector.shape_cast %98 : vector<1x8x128xf32> to vector<8x128xf32>
    %100 = vector.shape_cast %97 : vector<8x128xf32> to vector<1x8x128xf32>
    tpu.vector_store %arg21[%c0_73, %c0_74, %c0_75], %100 {strides = array<i32>} : memref<1x8x128xf32, #tpu.memory_space<vmem>>, vector<1x8x128xf32>,
    return
  }
  func.func @transform_0(%arg0: i32) -> (i32, i32, i32) {
    %c0_i32 = arith.constant 0 : i32
    %c0_i32_0 = arith.constant 0 : i32
    %c0_i32_1 = arith.constant 0 : i32
    return %arg0, %c0_i32, %c0_i32_0 : i32, i32, i32
  }
  func.func @transform_1(%arg0: i32) -> (i32, i32) {
    %c0_i32 = arith.constant 0 : i32
    %c0_i32_0 = arith.constant 0 : i32
    %c0_i32_1 = arith.constant 0 : i32
    return %c0_i32, %c0_i32_0 : i32, i32
  }
  func.func @transform_2(%arg0: i32) -> (i32, i32) {
    %c0_i32 = arith.constant 0 : i32
    %c0_i32_0 = arith.constant 0 : i32
    %c0_i32_1 = arith.constant 0 : i32
    return %c0_i32, %c0_i32_0 : i32, i32
  }
  func.func @transform_3(%arg0: i32) -> (i32, i32) {
    %c0_i32 = arith.constant 0 : i32
    %c0_i32_0 = arith.constant 0 : i32
    %c0_i32_1 = arith.constant 0 : i32
    return %c0_i32, %c0_i32_0 : i32, i32
  }
  func.func @transform_4(%arg0: i32) -> (i32, i32) {
    %c0_i32 = arith.constant 0 : i32
    %c0_i32_0 = arith.constant 0 : i32
    %c0_i32_1 = arith.constant 0 : i32
    return %c0_i32, %c0_i32_0 : i32, i32
  }
  func.func @transform_5(%arg0: i32) -> (i32, i32) {
    %c0_i32 = arith.constant 0 : i32
    %c0_i32_0 = arith.constant 0 : i32
    %c0_i32_1 = arith.constant 0 : i32
    return %c0_i32, %c0_i32_0 : i32, i32
  }
  func.func @transform_6(%arg0: i32) -> (i32, i32) {
    %c0_i32 = arith.constant 0 : i32
    %c0_i32_0 = arith.constant 0 : i32
    %c0_i32_1 = arith.constant 0 : i32
    return %c0_i32, %c0_i32_0 : i32, i32
  }
  func.func @transform_7(%arg0: i32) -> (i32, i32) {
    %c0_i32 = arith.constant 0 : i32
    %c0_i32_0 = arith.constant 0 : i32
    %c0_i32_1 = arith.constant 0 : i32
    return %c0_i32, %c0_i32_0 : i32, i32
  }
  func.func @transform_8(%arg0: i32) -> (i32, i32) {
    %c0_i32 = arith.constant 0 : i32
    %c0_i32_0 = arith.constant 0 : i32
    %c0_i32_1 = arith.constant 0 : i32
    return %c0_i32, %c0_i32_0 : i32, i32
  }
  func.func @transform_9(%arg0: i32) -> (i32, i32) {
    %c0_i32 = arith.constant 0 : i32
    %c0_i32_0 = arith.constant 0 : i32
    %c0_i32_1 = arith.constant 0 : i32
    return %c0_i32, %c0_i32_0 : i32, i32
  }
  func.func @transform_10(%arg0: i32) -> (i32, i32) {
    %c0_i32 = arith.constant 0 : i32
    %c0_i32_0 = arith.constant 0 : i32
    %c0_i32_1 = arith.constant 0 : i32
    return %c0_i32, %c0_i32_0 : i32, i32
  }
  func.func @transform_11(%arg0: i32) -> (i32, i32) {
    %c0_i32 = arith.constant 0 : i32
    %c0_i32_0 = arith.constant 0 : i32
    %c0_i32_1 = arith.constant 0 : i32
    return %c0_i32, %c0_i32_0 : i32, i32
  }
  func.func @transform_12(%arg0: i32) -> (i32, i32) {
    %c0_i32 = arith.constant 0 : i32
    %c0_i32_0 = arith.constant 0 : i32
    %c0_i32_1 = arith.constant 0 : i32
    return %c0_i32, %c0_i32_0 : i32, i32
  }
  func.func @transform_13(%arg0: i32) -> (i32, i32) {
    %c0_i32 = arith.constant 0 : i32
    %c0_i32_0 = arith.constant 0 : i32
    %c0_i32_1 = arith.constant 0 : i32
    return %c0_i32, %c0_i32_0 : i32, i32
  }
  func.func @transform_14(%arg0: i32) -> (i32, i32) {
    %c0_i32 = arith.constant 0 : i32
    %c0_i32_0 = arith.constant 0 : i32
    %c0_i32_1 = arith.constant 0 : i32
    return %c0_i32, %c0_i32_0 : i32, i32
  }
  func.func @transform_15(%arg0: i32) -> (i32, i32) {
    %c0_i32 = arith.constant 0 : i32
    %c0_i32_0 = arith.constant 0 : i32
    %c0_i32_1 = arith.constant 0 : i32
    return %c0_i32, %c0_i32_0 : i32, i32
  }
  func.func @transform_16(%arg0: i32) -> (i32, i32) {
    %c0_i32 = arith.constant 0 : i32
    %c0_i32_0 = arith.constant 0 : i32
    %c0_i32_1 = arith.constant 0 : i32
    return %c0_i32, %c0_i32_0 : i32, i32
  }
  func.func @transform_17(%arg0: i32) -> (i32, i32) {
    %c0_i32 = arith.constant 0 : i32
    %c0_i32_0 = arith.constant 0 : i32
    %c0_i32_1 = arith.constant 0 : i32
    return %c0_i32, %c0_i32_0 : i32, i32
  }
  func.func @transform_18(%arg0: i32) -> (i32, i32) {
    %c0_i32 = arith.constant 0 : i32
    %c0_i32_0 = arith.constant 0 : i32
    %c0_i32_1 = arith.constant 0 : i32
    return %c0_i32, %c0_i32_0 : i32, i32
  }
  func.func @transform_19(%arg0: i32) -> (i32, i32) {
    %c0_i32 = arith.constant 0 : i32
    %c0_i32_0 = arith.constant 0 : i32
    %c0_i32_1 = arith.constant 0 : i32
    return %c0_i32, %c0_i32_0 : i32, i32
  }
  func.func @transform_20(%arg0: i32) -> (i32, i32, i32) {
    %c0_i32 = arith.constant 0 : i32
    %c0_i32_0 = arith.constant 0 : i32
    %c0_i32_1 = arith.constant 0 : i32
    return %arg0, %c0_i32, %c0_i32_0 : i32, i32, i32
  }
}

</mosaic_0001>

<bundles_post_ra>
// kernel: tpu_custom_call.1
= control target key start
LH: loop header
LB: loop body
LE: loop exit
PB: predicated region body
PF: predicated region fallthrough
CT: control target
= control target key end

     0   :  { %s4511_s0 = inlined_call_operand.hbm [shape: f32[2,8,128], index: 0, kind: input, shape index: {}]   ;;  %s4512_s1 = inlined_call_operand.hbm [shape: f32[128,128], index: 1, kind: input, shape index: {}]   ;;  %s4513_s2 = inlined_call_operand.hbm [shape: f32[128,128], index: 2, kind: input, shape index: {}]   ;;  %s4514_s3 = inlined_call_operand.hbm [shape: f32[128,128], index: 3, kind: input, shape index: {}]   ;;  %s4515_s4 = inlined_call_operand.vmem [shape: f32[1,128], index: 4, kind: input, shape index: {}]   ;;  %s4516_s5 = inlined_call_operand.vmem [shape: f32[1,128], index: 5, kind: input, shape index: {}]   ;;  %s4517_s6 = inlined_call_operand.vmem [shape: f32[1,128], index: 6, kind: input, shape index: {}]   ;;  %s4518_s7 = inlined_call_operand.vmem [shape: f32[1,128], index: 7, kind: input, shape index: {}]   ;;  %s4519_s8 = inlined_call_operand.hbm [shape: f32[256,128], index: 8, kind: input, shape index: {}]   ;;  %s4520_s9 = inlined_call_operand.hbm [shape: f32[256,128], index: 9, kind: input, shape index: {}]   ;;  %s4521_s10 = inlined_call_operand.vmem [shape: f32[1,128], index: 10, kind: input, shape index: {}]   ;;  %s4522_s11 = inlined_call_operand.vmem [shape: f32[1,128], index: 11, kind: input, shape index: {}]   ;;  %s4523_s12 = inlined_call_operand.vmem [shape: f32[1,128], index: 12, kind: input, shape index: {}]   ;;  %s4524_s13 = inlined_call_operand.vmem [shape: f32[1,128], index: 13, kind: input, shape index: {}]   ;;  %s4525_s14 = inlined_call_operand.hbm [shape: f32[384,128], index: 14, kind: input, shape index: {}]   ;;  %s4526_s15 = inlined_call_operand.hbm [shape: f32[384,128], index: 15, kind: input, shape index: {}]   ;;  %s4527_s16 = inlined_call_operand.vmem [shape: f32[1,128], index: 16, kind: input, shape index: {}]   ;;  %s4528_s17 = inlined_call_operand.vmem [shape: f32[1,128], index: 17, kind: input, shape index: {}]   ;;  %s4529_s18 = inlined_call_operand.vmem [shape: f32[1,128], index: 18, kind: input, shape index: {}]   ;;  %s4530_s19 = inlined_call_operand.vmem [shape: f32[1,128], index: 19, kind: input, shape index: {}]   ;;  %s4531_s20 = inlined_call_operand.hbm [shape: f32[2,8,128], index: 20, kind: output, shape index: {}]  }
   0x1   :  { %4542 = sst [smem:[#allocation24_spill]] %s4511_s0 }
   0x2   :  { %4543 = sst [smem:[#allocation25_spill]] %s4512_s1 }
   0x3   :  { %4544 = sst [smem:[#allocation26_spill]] %s4513_s2 }
   0x4   :  { %4545 = sst [smem:[#allocation27_spill]] %s4514_s3 }
   0x5   :  { %4546 = sst [smem:[#allocation28_spill]] %s4515_s4 }
   0x6   :  { %4547 = sst [smem:[#allocation29_spill]] %s4516_s5 }
   0x7   :  { %4548 = sst [smem:[#allocation30_spill]] %s4517_s6 }
   0x8   :  { %4549 = sst [smem:[#allocation31_spill]] %s4521_s10 }
   0x9   :  { %4550 = sst [smem:[#allocation32_spill]] %s4522_s11 }
   0xa   :  { %4551 = sst [smem:[#allocation33_spill]] %s4523_s12 }
   0xb   :  { %4552 = sst [smem:[#allocation34_spill]] %s4524_s13 }
   0xc   :  { %4553 = sst [smem:[#allocation35_spill]] %s4527_s16 }
   0xd   :  { %4554 = sst [smem:[#allocation36_spill]] %s4528_s17 }
   0xe   :  { %4555 = sst [smem:[#allocation37_spill]] %s4529_s18 }
   0xf   :  { %4556 = sst [smem:[#allocation38_spill]] %s4530_s19 }
  0x10   :  { %4557 = sst [smem:[#allocation39_spill]] %s4531_s20 }
  0x11   :  { %25 = vsyncpa [#allocation4], 0 }
  0x12   :  { %27 = vsyncpa [#allocation4 + $0x1], 0 }
  0x13   :  { %28 = vsyncpa [#allocation7], 0 }
  0x14   :  { %29 = vsyncpa [#allocation10], 0 }
  0x15   :  { %30 = vsyncpa [#allocation13], 0 }
  0x16   :  { %31 = vsyncpa [#allocation16], 0 }
  0x17   :  { %32 = vsyncpa [#allocation5], 0 }
  0x18   :  { %34 = vsyncpa [#allocation5 + $0x1], 0  ;;  %s3921_s1 = smov 0   ;;  %s3923_s22 = smov 0  }
  0x19   :  { %s3925_s23 = smov 0   ;;  %s3927_s24 = smov 0  }
  0x1a LB: > { %s3802_s2 = smov [#allocation6]   ;;  %s3942_s3 = sadd.s32 4294967295, %s3800_s24   ;;  %s3800_s24 = sphi %s3927_s24, %s4597_s24   ;;  %s3796_s23 = sphi %s3925_s23, %s4596_s23   ;;  %s3792_s22 = sphi %s3923_s22, %s4595_s22   ;;  %s3788_s1 = sphi %s3921_s1, %s4594_s1  }
  0x1b   : > { %s508_s25 = sshll.u32 %s3802_s2, 4  ;;  %p2299_p0 = scmp.ge.s32.totalorder %s3800_s24, 1  ;;  %s3947_s25 = int_to_ptr.vmem [resolvable:$true] %s508_s25 }
  0x1c   : > { %p4539_p1 = scmp.eq.s32.totalorder %s3942_s3, 0  ;;  %p496_p2 = scmp.lt.s32.totalorder %s3800_s24, 3 }
  0x1d   : > { %s3803_s27 = smov [#allocation9]   ;;  %s3804_s29 = smov [#allocation12]  }
  0x1e   : > { %p3949_p3 = pnand %p2299_p0, %p496_p2  ;;  %s534_s28 = sshll.u32 %s3803_s27, 4  ;;  %s3962_s28 = int_to_ptr.vmem [resolvable:$true] %s534_s28 }
  0x1f   : > { %s572_s30 = sshll.u32 %s3804_s29, 4  ;;  %s4560_s2 = sld [smem:[#allocation25_spill]]  ;;  %s3964_s30 = int_to_ptr.vmem [resolvable:$true] %s572_s30 }
  0x20   : > { %s4558_s26 = scalar_select %p3949_p3, 1, 0 }
  0x21   : > { %p3396_p5 = pneg %p3949_p3 }
  0x23   : > { %p3958_p6 = pnand %p3396_p5, %p4539_p1 }
  0x25   : > { %s3492_s20 = scalar_lea.hbm %s4560_s2, 2048  ;;  %p3974_p8 = pneg %p3958_p6 }
  0x26   : > { %p3493_p7 = scmp.ne.s32.totalorder %s4560_s2, %s3492_s20  ;;  %p3499_p11 = scmp.lt.u32.totalorder %s3492_s20, %s4560_s2 }
  0x28   : > { %p3495_p9 = pnand %p3974_p8, %p3493_p7 }
  0x2a   : > { %p3496_p10 = pneg %p3495_p9 }
  0x2c   : > { %p3501_p12 = pnand %p3499_p11, %p3496_p10 }
  0x2e   : > { %3504 = shalt.err (!%p3501_p12)
}
  0x2f   : > { %s3505_s18 = scalar_lea.vmem %s3947_s25, 2048  ;;  %p3513_p5 = scmp.lt.s32.totalorder %s3947_s25, %s3947_s25 }
  0x30   : > { %p3506_p13 = scmp.ne.s32.totalorder %s3947_s25, %s3505_s18  ;;  %p3514_p4 = scmp.lt.s32.totalorder %s3505_s18, %s3505_s18 }
  0x32   : > { %p3508_p0 = pnand %p3506_p13, %p3974_p8  ;;  %p3515_p7 = por %p3514_p4, %p3513_p5 }
  0x34   : > { %p3509_p2 = pneg %p3508_p0 }
  0x36   : > { %p3516_p9 = pnand %p3515_p7, %p3509_p2 }
  0x38   : > { %3519 = shalt.err (!%p3516_p9)
}
  0x39   : > { %s3805_s19 = smov 128   ;;  %s3806_s17 = smov 8  }
  0x3a   : > { %3399 = dma.hbm_to_vmem [thread:$0]  (!%p3958_p6), %s4560_s2, 2048, %s3947_s25, [#allocation7], %s3805_s19, %s3805_s19, %s3806_s17  }
  0x3b   : > { %s4562_s16 = sld [smem:[#allocation27_spill]] }
  0x41   : > { %s3520_s18 = scalar_lea.hbm %s4562_s16, 2048 }
  0x42   : > { %p3521_p4 = scmp.ne.s32.totalorder %s4562_s16, %s3520_s18  ;;  %p3527_p12 = scmp.lt.u32.totalorder %s3520_s18, %s4562_s16 }
  0x44   : > { %p3523_p10 = pnand %p3521_p4, %p3974_p8 }
  0x46   : > { %p3524_p11 = pneg %p3523_p10 }
  0x48   : > { %p3529_p13 = pnand %p3527_p12, %p3524_p11 }
  0x4a   : > { %3532 = shalt.err (!%p3529_p13)
}
  0x4b   : > { %s3533_s25 = scalar_lea.vmem %s3962_s28, 2048  ;;  %p3541_p7 = scmp.lt.s32.totalorder %s3962_s28, %s3962_s28 }
  0x4c   : > { %p3534_p0 = scmp.ne.s32.totalorder %s3962_s28, %s3533_s25  ;;  %p3542_p9 = scmp.lt.s32.totalorder %s3533_s25, %s3533_s25 }
  0x4e   : > { %p3536_p2 = pnand %p3534_p0, %p3974_p8  ;;  %p3543_p4 = por %p3542_p9, %p3541_p7 }
  0x50   : > { %p3537_p5 = pneg %p3536_p2 }
  0x52   : > { %p3544_p10 = pnand %p3543_p4, %p3537_p5 }
  0x54   : > { %3547 = shalt.err (!%p3544_p10)
}
  0x55   : > { %3405 = dma.hbm_to_vmem [thread:$0]  (!%p3958_p6), %s4562_s16, 2048, %s3962_s28, [#allocation10], %s3805_s19, %s3805_s19, %s3806_s17  }
  0x56   : > { %s3548_s20 = scalar_lea.hbm %s4520_s9, 4096 }
  0x57   : > { %p3549_p11 = scmp.ne.s32.totalorder %s4520_s9, %s3548_s20  ;;  %p3555_p0 = scmp.lt.u32.totalorder %s3548_s20, %s4520_s9 }
  0x59   : > { %p3551_p12 = pnand %p3549_p11, %p3974_p8 }
  0x5b   : > { %p3552_p13 = pneg %p3551_p12 }
  0x5d   : > { %p3557_p2 = pnand %p3555_p0, %p3552_p13 }
  0x5f   : > { %3560 = shalt.err (!%p3557_p2)
}
  0x60   : > { %s3561_s28 = scalar_lea.vmem %s3964_s30, 4096  ;;  %p3569_p4 = scmp.lt.s32.totalorder %s3964_s30, %s3964_s30 }
  0x61   : > { %p3562_p5 = scmp.ne.s32.totalorder %s3964_s30, %s3561_s28  ;;  %p3570_p10 = scmp.lt.s32.totalorder %s3561_s28, %s3561_s28 }
  0x63   : > { %p3564_p7 = pnand %p3562_p5, %p3974_p8  ;;  %p3571_p11 = por %p3570_p10, %p3569_p4 }
  0x65   : > { %p3565_p9 = pneg %p3564_p7 }
  0x67   : > { %p3572_p12 = pnand %p3571_p11, %p3565_p9 }
  0x69   : > { %3575 = shalt.err (!%p3572_p12)
}
  0x6a   : > { %3411 = dma.hbm_to_vmem [thread:$0]  (!%p3958_p6), %s4520_s9, 4096, %s3964_s30, [#allocation13], %s3805_s19, %s3805_s19, %s3806_s17  }
  0x6b   : > { %s3807_s11 = smov [#allocation8]   ;;  %s3808_s13 = smov [#allocation11]  }
  0x6c   : > { %s521_s12 = sshll.u32 %s3807_s11, 4  ;;  %s559_s20 = sshll.u32 %s3808_s13, 4  ;;  %s522_s12 = int_to_ptr.vmem [resolvable:$true] %s521_s12  ;;  %s560_s20 = int_to_ptr.vmem [resolvable:$true] %s559_s20 }
  0x6d   : > { %s4563_s29 = sld [smem:[#allocation26_spill]] }
  0x73   : > { %s3576_s18 = scalar_lea.hbm %s4563_s29, 2048 }
  0x74   : > { %p3577_p13 = scmp.ne.s32.totalorder %s4563_s29, %s3576_s18  ;;  %p3583_p5 = scmp.lt.u32.totalorder %s3576_s18, %s4563_s29 }
  0x76   : > { %p3579_p0 = pnand %p3577_p13, %p3974_p8 }
  0x78   : > { %p3580_p2 = pneg %p3579_p0 }
  0x7a   : > { %p3585_p7 = pnand %p3583_p5, %p3580_p2 }
  0x7c   : > { %3588 = shalt.err (!%p3585_p7)
}
  0x7d   : > { %s3589_s30 = scalar_lea.vmem %s522_s12, 2048  ;;  %p3597_p11 = scmp.lt.s32.totalorder %s522_s12, %s522_s12 }
  0x7e   : > { %p3590_p9 = scmp.ne.s32.totalorder %s522_s12, %s3589_s30  ;;  %p3598_p12 = scmp.lt.s32.totalorder %s3589_s30, %s3589_s30 }
  0x80   : > { %p3592_p4 = pnand %p3590_p9, %p3974_p8  ;;  %p3599_p1 = por %p3598_p12, %p3597_p11 }
  0x82   : > { %p3593_p10 = pneg %p3592_p4 }
  0x84   : > { %p3600_p3 = pnand %p3599_p1, %p3593_p10 }
  0x86   : > { %3603 = shalt.err (!%p3600_p3)
}
  0x87   : > { %3402 = dma.hbm_to_vmem [thread:$0]  (!%p3958_p6), %s4563_s29, 2048, %s522_s12, [#allocation7], %s3805_s19, %s3805_s19, %s3806_s17  }
  0x88   : > { %s3604_s13 = scalar_lea.hbm %s4519_s8, 4096 }
  0x89   : > { %p3605_p1 = scmp.ne.s32.totalorder %s4519_s8, %s3604_s13  ;;  %p3611_p0 = scmp.lt.u32.totalorder %s3604_s13, %s4519_s8 }
  0x8b   : > { %p3607_p3 = pnand %p3605_p1, %p3974_p8 }
  0x8d   : > { %p3608_p13 = pneg %p3607_p3 }
  0x8f   : > { %p3613_p2 = pnand %p3611_p0, %p3608_p13 }
  0x91   : > { %3616 = shalt.err (!%p3613_p2)
}
  0x92   : > { %s3617_s25 = scalar_lea.vmem %s560_s20, 4096  ;;  %p3625_p4 = scmp.lt.s32.totalorder %s560_s20, %s560_s20 }
  0x93   : > { %p3618_p5 = scmp.ne.s32.totalorder %s560_s20, %s3617_s25  ;;  %p3626_p10 = scmp.lt.s32.totalorder %s3617_s25, %s3617_s25 }
  0x95   : > { %p3620_p7 = pnand %p3618_p5, %p3974_p8  ;;  %p3627_p11 = por %p3626_p10, %p3625_p4 }
  0x97   : > { %p3621_p9 = pneg %p3620_p7 }
  0x99   : > { %p3628_p12 = pnand %p3627_p11, %p3621_p9 }
  0x9b   : > { %3631 = shalt.err (!%p3628_p12)
}
  0x9c   : > { %3408 = dma.hbm_to_vmem [thread:$0]  (!%p3958_p6), %s4519_s8, 4096, %s560_s20, [#allocation10], %s3805_s19, %s3805_s19, %s3806_s17  }
  0x9d   : > { %s3809_s16 = smov [#allocation14]   ;;  %s3810_s10 = smov [#allocation15]  }
  0x9e   : > { %s597_s2 = sshll.u32 %s3809_s16, 4  ;;  %s610_s11 = sshll.u32 %s3810_s10, 4  ;;  %s598_s2 = int_to_ptr.vmem [resolvable:$true] %s597_s2  ;;  %s611_s11 = int_to_ptr.vmem [resolvable:$true] %s610_s11 }
  0x9f   : > { %s3632_s21 = scalar_lea.hbm %s4525_s14, 6144 }
  0xa0   : > { %p3633_p1 = scmp.ne.s32.totalorder %s4525_s14, %s3632_s21  ;;  %p3639_p0 = scmp.lt.u32.totalorder %s3632_s21, %s4525_s14 }
  0xa2   : > { %p3635_p3 = pnand %p3633_p1, %p3974_p8 }
  0xa4   : > { %p3636_p13 = pneg %p3635_p3 }
  0xa6   : > { %p3641_p2 = pnand %p3639_p0, %p3636_p13 }
  0xa8   : > { %3644 = shalt.err (!%p3641_p2)
}
  0xa9   : > { %s3645_s20 = scalar_lea.vmem %s598_s2, 6144  ;;  %p3653_p4 = scmp.lt.s32.totalorder %s598_s2, %s598_s2 }
  0xaa   : > { %p3646_p5 = scmp.ne.s32.totalorder %s598_s2, %s3645_s20  ;;  %p3654_p10 = scmp.lt.s32.totalorder %s3645_s20, %s3645_s20 }
  0xac   : > { %p3648_p7 = pnand %p3646_p5, %p3974_p8  ;;  %p3655_p11 = por %p3654_p10, %p3653_p4 }
  0xae   : > { %p3649_p9 = pneg %p3648_p7 }
  0xb0   : > { %p3656_p12 = pnand %p3655_p11, %p3649_p9 }
  0xb2   : > { %3659 = shalt.err (!%p3656_p12)
}
  0xb3   : > { %3414 = dma.hbm_to_vmem [thread:$0]  (!%p3958_p6), %s4525_s14, 6144, %s598_s2, [#allocation13], %s3805_s19, %s3805_s19, %s3806_s17  }
  0xb4   : > { %s3660_s0 = scalar_lea.hbm %s4526_s15, 6144 }
  0xb5   : > { %p3661_p1 = scmp.ne.s32.totalorder %s4526_s15, %s3660_s0  ;;  %p3667_p0 = scmp.lt.u32.totalorder %s3660_s0, %s4526_s15 }
  0xb7   : > { %p3663_p3 = pnand %p3661_p1, %p3974_p8 }
  0xb9   : > { %p3664_p13 = pneg %p3663_p3 }
  0xbb   : > { %p3669_p2 = pnand %p3667_p0, %p3664_p13 }
  0xbd   : > { %3672 = shalt.err (!%p3669_p2)
}
  0xbe   : > { %s3673_s12 = scalar_lea.vmem %s611_s11, 6144  ;;  %p3681_p4 = scmp.lt.s32.totalorder %s611_s11, %s611_s11 }
  0xbf   : > { %p3674_p5 = scmp.ne.s32.totalorder %s611_s11, %s3673_s12  ;;  %p3682_p10 = scmp.lt.s32.totalorder %s3673_s12, %s3673_s12 }
  0xc1   : > { %p3676_p7 = pnand %p3674_p5, %p3974_p8  ;;  %p3683_p11 = por %p3682_p10, %p3681_p4 }
  0xc3   : > { %p3677_p9 = pneg %p3676_p7 }
  0xc5   : > { %p3684_p12 = pnand %p3683_p11, %p3677_p9 }
  0xc7   : > { %3687 = shalt.err (!%p3684_p12)
}
  0xc8   : > { %3417 = dma.hbm_to_vmem [thread:$0]  (!%p3958_p6), %s4526_s15, 6144, %s611_s11, [#allocation16], %s3805_s19, %s3805_s19, %s3806_s17  }
  0xc9   : > { %s2298_s4 = sadd.s32 4294967294, %s3800_s24   ;;  %s4136_s27 = sadd.s32 1, %s3800_s24  }
  0xca   : > { %s47_s30 = sadd.s32 1, %s3796_s23  ;;  %s44_s16 = ssub.s32 %s3800_s24, %s4136_s27 }
  0xcb   : > { %p54_p8 = scmp.ne.s32.totalorder %s3796_s23, %s3792_s22  ;;  %p45_p1 = scmp.eq.s32.totalorder %s44_s16, 0 }
  0xcc   : > { %p55_p3 = scmp.eq.s32.totalorder %s3800_s24, 0  ;;  %p60_p13 = scmp.ne.s32.totalorder %s3792_s22, %s3788_s1 }
  0xcd   : > { %p483_p0 = scmp.eq.s32.totalorder %s3942_s3, 1  ;;  %p4564_p5 = scmp.eq.s32.totalorder %s3942_s3, 0 }
  0xce   : > { %s4148_s10 = scalar_select %p45_p1, %s3796_s23, %s47_s30  }
  0xcf   : > { %p56_p2 = por %p55_p3, %p54_p8  ;;  %p4152_p7 = por %p4564_p5, %p60_p13 }
  0xd0   : > { %p4156_p6 = por %p483_p0, %p54_p8  ;;  %p489_p9 = scmp.eq.s32.totalorder %s2298_s4, 1 }
  0xd1   : > { %p3433_p4 = scmp.lt.s32.totalorder %s3800_s24, 2  ;;  %s636_s17 = sand.u32 1, %s3796_s23  }
  0xd2   : > { %s4566_s19 = scalar_select %p4156_p6, 1, 0 }
  0xd3   : > { %p4162_p10 = por %p489_p9, %p60_p13  ;;  %s2308_s0 = sshll.u32 %s636_s17, 3 }
  0xd4   : > { %s2309_s21 = sshll.u32 %s3800_s24, 7  ;;  %s4568_s25 = sld [smem:[#allocation24_spill]] }
  0xd5   : > { %s4567_s11 = scalar_select %p4162_p10, 1, 0 }
  0xd6   : > { %s640_s2 = scalar_lea.vmem [#allocation3], %s2308_s0  ;;  %p4172_p11 = pnand %p3433_p4, %p56_p2 }
  0xd7   : > { %s647_s20 = sshll.u32 %s640_s2, 4  ;;  %s637_s30 = scalar_lea.sflag [#allocation4], %s636_s17  ;;  %s4176_s20 = int_to_ptr.vmem [resolvable:$true] %s647_s20 }
  0xd8   : > { %p3690_p8 = pneg %p4172_p11 }
  0xda   : > { %s4170_s12 = scalar_lea.hbm %s4568_s25, %s2309_s21  ;;  %s3693_s18 = scalar_lea.hbm %s4568_s25, 256 }
  0xdb   : > { %s3688_s16 = scalar_lea.hbm %s4170_s12, 128  ;;  %p3694_p13 = scmp.lt.u32.totalorder %s4170_s12, %s4568_s25 }
  0xdc   : > { %p3689_p12 = scmp.ne.s32.totalorder %s4170_s12, %s3688_s16  ;;  %p3695_p0 = scmp.lt.u32.totalorder %s3693_s18, %s3688_s16 }
  0xdd   : > { %p3697_p5 = scmp.lt.u32.totalorder %s3688_s16, %s4170_s12 }
  0xde   : > { %p3691_p1 = pnand %p3690_p8, %p3689_p12  ;;  %p3696_p2 = por %p3695_p0, %p3694_p13 }
  0xe0   : > { %p3692_p3 = pneg %p3691_p1  ;;  %p3698_p9 = por %p3697_p5, %p3696_p2 }
  0xe2   : > { %p3699_p4 = pnand %p3698_p9, %p3692_p3 }
  0xe4   : > { %3702 = shalt.err (!%p3699_p4)
}
  0xe5   : > { %s3703_s17 = scalar_lea.vmem %s4176_s20, 128  ;;  %s3811_s21 = smov [#allocation3]  }
  0xe6   : > { %p3704_p12 = scmp.ne.s32.totalorder %s4176_s20, %s3703_s17  ;;  %s3708_s0 = sshll.u32 %s3811_s21, 4  ;;  %s3709_s0 = int_to_ptr.vmem [resolvable:$false] %s3708_s0 }
  0xe7   : > { %s3710_s28 = scalar_lea.vmem %s3709_s0, 256  ;;  %p3711_p6 = scmp.lt.s32.totalorder %s4176_s20, %s3709_s0 }
  0xe8   : > { %p3706_p1 = pnand %p3704_p12, %p3690_p8  ;;  %p3712_p13 = scmp.lt.s32.totalorder %s3710_s28, %s3703_s17 }
  0xea   : > { %p3707_p10 = pneg %p3706_p1  ;;  %p3713_p0 = por %p3712_p13, %p3711_p6 }
  0xec   : > { %p3714_p2 = pnand %p3713_p0, %p3707_p10 }
  0xee   : > { %3717 = shalt.err (!%p3714_p2)
}
  0xef   : > { %3421 = dma.hbm_to_vmem [thread:$0]  (!%p4172_p11), %s4170_s12, 128, %s4176_s20, %s637_s30  }
  0xf0   : > { %p4570_p3 = scmp.ne.s32.totalorder %s4558_s26, 0 }
  0xf1   : > { %s4206_s16 = sand.u32 (!%p4570_p3), 1, %s3792_s22  }
  0xf2   : > { %656 = sbr.rel (%p4570_p3) target bundleno = 2372 (0x944), region = 100  ;;  %s2311_s18 = sshll.u32 (!%p4570_p3), %s4206_s16, 3 }
  0xf3   : > { %s659_s2 = scalar_lea.sflag (!%p4570_p3), [#allocation4], %s4206_s16  ;;  %s4212_s17 = scalar_lea.vmem (!%p4570_p3), [#allocation3], %s2311_s18 }
  0xf9   : > { %3763 = dma.done.wait (%p4152_p7), %s659_s2, 128  }
  0xfa   : > { %3765 = vsyncadd (%p4152_p7), %s659_s2, 4294967168  ;;  %p4571_p6 = scmp.eq.s32.totalorder %s3942_s3, 0 }
  0xfc   : > { %3767 = dma.done.wait (%p4571_p6), [#allocation7], 4096   ;;  %p4572_p10 = pmov %p4571_p6 }
  0xfd   : > { %p4573_p11 = pmov %p4571_p6 }
  0xfe   : > { %3769 = vsyncadd (%p4572_p10), [#allocation7], 4294963200 }
  0xff   : > { %3771 = dma.done.wait (%p4573_p11), [#allocation10], 6144   ;;  %p4574_p8 = pmov %p4571_p6 }
 0x100   : > { %p4575_p5 = pmov %p4571_p6 }
 0x101   : > { %3773 = vsyncadd (%p4574_p8), [#allocation10], 4294961152 }
 0x102   : > { %3775 = dma.done.wait (%p4575_p5), [#allocation13], 10240   ;;  %p4576_p9 = pmov %p4575_p5 }
 0x103   : > { %p4577_p7 = pmov %p4575_p5 }
 0x104   : > { %3777 = vsyncadd (%p4576_p9), [#allocation13], 4294957056 }
 0x105   : > { %3779 = dma.done.wait (%p4577_p7), [#allocation16], 6144   ;;  %p4578_p4 = pmov %p4575_p5 }
 0x106   : > { %v3812_v0 = vmov 0.0|0.0   ;;  %v3813_v1 = vmov 0.0   ;;  %vm3814_vm0 = vmmov 0   ;;  %v792_v2 = vld [vmem:[#allocation9] sm:$0xff]  ;;  %v793_v3 = vld [vmem:[#allocation9 + $0x8] sm:$0xff]  ;;  %v794_v7 = vld [vmem:[#allocation9 + $0x10] sm:$0xff] }
 0x107   : > { %3781 = vsyncadd (%p4578_p4), [#allocation16], 4294961152  ;;  %2996 = vmatprep.subr.bf16.mxu0 %v3812_v0  ;;  %3020 = vmatprep.subr.bf16.mxu1 %v3812_v0  ;;  %747 = vst [vmem:[#allocation2] sm:$0xf] %v3813_v1  ;;  %v776_v4 = vld [vmem:[#allocation8] sm:$0xff]  ;;  %v2997_v5 = vpack.c.bf16 %v793_v3, %v792_v2  ;;  %v777_v6 = vld [vmem:[#allocation8 + $0x8] sm:$0xff] }
 0x108   : > { %748 = vst [vmem:[#allocation2 + $0x8] sm:$0xf] %v3813_v1  ;;  %749 = vst [vmem:[#allocation2 + $0x10] sm:$0xf] %v3813_v1  ;;  %2678 = vmatprep.mubr.msk.f32.mxu0 %vm3814_vm0, %v3813_v1  ;;  %2713 = vmatprep.mubr.msk.f32.mxu1 %vm3814_vm0, %v3813_v1  ;;  %v795_v8 = vld [vmem:[#allocation9 + $0x18] sm:$0xff]  ;;  %v3021_v9 = vpack.c.bf16 %v777_v6, %v776_v4  ;;  %v778_v10 = vld [vmem:[#allocation8 + $0x10] sm:$0xff] }
 0x109   : > { %v779_v11 = vld [vmem:[#allocation8 + $0x18] sm:$0xff]  ;;  %2998 = vmatpush3.bf16.msra.mxu0 %v2997_v5  ;;  %v3000_v12 = vpack.c.bf16 %v795_v8, %v794_v7  ;;  %v796_v14 = vld [vmem:[#allocation9 + $0x20] sm:$0xff]  ;;  %v797_v15 = vld [vmem:[#allocation9 + $0x28] sm:$0xff]  ;;  %vm810_vm1 = vcmask 1043456   ;;  %vm887_vm2 = vcmask 1044480   ;;  %s4579_s12 = sld [smem:[#allocation28_spill]] }
 0x10a   : > { %3022 = vmatpush3.bf16.msra.mxu1 %v3021_v9  ;;  %2999 = vmatprep.subr.bf16.mxu0 %v3812_v0  ;;  %v3024_v13 = vpack.c.bf16 %v779_v11, %v778_v10  ;;  %v780_v16 = vld [vmem:[#allocation8 + $0x20] sm:$0xff]  ;;  %v781_v17 = vld [vmem:[#allocation8 + $0x28] sm:$0xff]  ;;  %v3003_v18 = vpack.c.bf16 %v797_v15, %v796_v14  ;;  %v798_v20 = vld [vmem:[#allocation9 + $0x30] sm:$0xff]  ;;  %s4580_s5 = sld [smem:[#allocation29_spill]]  ;;  %s4581_s6 = sld [smem:[#allocation30_spill]]  ;;  %vm1303_vm4 = vcmask 1045504  }
 0x10b   : > { %3023 = vmatprep.subr.bf16.mxu1 %v3812_v0  ;;  %v3027_v19 = vpack.c.bf16 %v781_v17, %v780_v16  ;;  %v799_v21 = vld [vmem:[#allocation9 + $0x38] sm:$0xff]  ;;  %v782_v22 = vld [vmem:[#allocation8 + $0x30] sm:$0xff]  ;;  %v800_v28 = vld [vmem:[#allocation9 + $0x40] sm:$0xff]  ;;  %s4582_s26 = sld [smem:[#allocation31_spill]]  ;;  %s4583_s20 = sld [smem:[#allocation32_spill]] }
 0x10c   : > { %v783_v23 = vld [vmem:[#allocation8 + $0x38] sm:$0xff]  ;;  %v3006_v25 = vpack.c.bf16 %v799_v21, %v798_v20  ;;  %v801_v29 = vld [vmem:[#allocation9 + $0x48] sm:$0xff]  ;;  %v784_v30 = vld [vmem:[#allocation8 + $0x40] sm:$0xff]  ;;  %s4584_s21 = sld [smem:[#allocation33_spill]]  ;;  %s4585_s2 = sld [smem:[#allocation34_spill]] }
 0x10d   : > { %3001 = vmatpush3.bf16.msra.mxu0 %v3000_v12  ;;  %v750_v24 = vld [vmem:[%s4212_s17] sm:$0xff]  ;;  %v3030_v27 = vpack.c.bf16 %v783_v23, %v782_v22  ;;  %v785_v31 = vld [vmem:[#allocation8 + $0x48] sm:$0xff]  ;;  %v3009_v32 = vpack.c.bf16 %v801_v29, %v800_v28  ;;  %v804_v40 = vld [vmem:[#allocation9 + $0x60] sm:$0xff]  ;;  %s4586_s13 = sld [smem:[#allocation35_spill]]  ;;  %s4587_s4 = sld [smem:[#allocation36_spill]] }
 0x10e   : > { %3025 = vmatpush3.bf16.msra.mxu1 %v3024_v13  ;;  %3002 = vmatprep.subr.bf16.mxu0 %v3812_v0  ;;  %v752_v26 = vrot.slane %v750_v24, 4  ;;  %v3033_v33 = vpack.c.bf16 %v785_v31, %v784_v30  ;;  %v802_v34 = vld [vmem:[#allocation9 + $0x50] sm:$0xff]  ;;  %v803_v35 = vld [vmem:[#allocation9 + $0x58] sm:$0xff]  ;;  %v805_v41 = vld [vmem:[#allocation9 + $0x68] sm:$0xff]  ;;  %s4588_s0 = sld [smem:[#allocation37_spill]]  ;;  %s4589_s17 = sld [smem:[#allocation38_spill]] }
 0x10f   : > { %3026 = vmatprep.subr.bf16.mxu1 %v3812_v0  ;;  %v786_v36 = vld [vmem:[#allocation8 + $0x50] sm:$0xff]  ;;  %v787_v37 = vld [vmem:[#allocation8 + $0x58] sm:$0xff]  ;;  %v3012_v38 = vpack.c.bf16 %v803_v35, %v802_v34  ;;  %v788_v42 = vld [vmem:[#allocation8 + $0x60] sm:$0xff]  ;;  %v3015_v44 = vpack.c.bf16 %v805_v41, %v804_v40  ;;  %s2148_s30 = scalar_lea.sflag [#allocation5], %s4206_s16  ;;  %p4591_p1 = scmp.ne.s32.totalorder %s4566_s19, 0 }
 0x110   : > { %754 = vst [vmem:[#allocation2 + $0x18] ss:$-20 sps:$4 sm:$0xff] %v752_v26   ;;  %v3036_v39 = vpack.c.bf16 %v787_v37, %v786_v36  ;;  %v789_v43 = vld [vmem:[#allocation8 + $0x68] sm:$0xff]  ;;  %v806_v45 = vld [vmem:[#allocation9 + $0x70] sm:$0xff]  ;;  %v807_v46 = vld [vmem:[#allocation9 + $0x78] sm:$0xff] }
 0x111   : > { %3004 = vmatpush3.bf16.msra.mxu0 %v3003_v18  ;;  %v3039_v47 = vpack.c.bf16 %v789_v43, %v788_v42  ;;  %v790_v48 = vld [vmem:[#allocation8 + $0x70] sm:$0xff]  ;;  %v791_v51 = vld [vmem:[#allocation8 + $0x78] sm:$0xff]  ;;  %v3018_v54 = vpack.c.bf16 %v807_v46, %v806_v45  ;;  %v756_v60 = vld [vmem:[#allocation6] sm:$0xff] }
 0x112   : > { %3028 = vmatpush3.bf16.msra.mxu1 %v3027_v19  ;;  %3005 = vmatprep.subr.bf16.mxu0 %v3812_v0  ;;  %v3042_v57 = vpack.c.bf16 %v791_v51, %v790_v48  ;;  %v757_v61 = vld [vmem:[#allocation6 + $0x8] sm:$0xff]  ;;  %v758_v3 = vld [vmem:[#allocation6 + $0x10] sm:$0xff]  ;;  %v759_v4 = vld [vmem:[#allocation6 + $0x18] sm:$0xff] }
 0x113   : > { %3029 = vmatprep.subr.bf16.mxu1 %v3812_v0  ;;  %v4259_v63 = vpack.c.bf16 %v757_v61, %v756_v60  ;;  %v4264_v5 = vpack.c.bf16 %v759_v4, %v758_v3  ;;  %v760_v6 = vld [vmem:[#allocation6 + $0x20] sm:$0xff]  ;;  %v761_v7 = vld [vmem:[#allocation6 + $0x28] sm:$0xff]  ;;  %v762_v9 = vld [vmem:[#allocation6 + $0x30] sm:$0xff] }
 0x114   : > { %v4274_v8 = vpack.c.bf16 %v761_v7, %v760_v6  ;;  %v763_v10 = vld [vmem:[#allocation6 + $0x38] sm:$0xff]  ;;  %v764_v12 = vld [vmem:[#allocation6 + $0x40] sm:$0xff]  ;;  %v765_v13 = vld [vmem:[#allocation6 + $0x48] sm:$0xff] }
 0x115   : > { %3007 = vmatpush3.bf16.msra.mxu0 %v3006_v25  ;;  %v4280_v11 = vpack.c.bf16 %v763_v10, %v762_v9  ;;  %v4286_v14 = vpack.c.bf16 %v765_v13, %v764_v12  ;;  %v766_v15 = vld [vmem:[#allocation6 + $0x50] sm:$0xff]  ;;  %v767_v16 = vld [vmem:[#allocation6 + $0x58] sm:$0xff]  ;;  %v768_v18 = vld [vmem:[#allocation6 + $0x60] sm:$0xff] }
 0x116   : > { %3031 = vmatpush3.bf16.msra.mxu1 %v3030_v27  ;;  %3008 = vmatprep.subr.bf16.mxu0 %v3812_v0  ;;  %v4292_v17 = vpack.c.bf16 %v767_v16, %v766_v15  ;;  %v769_v19 = vld [vmem:[#allocation6 + $0x68] sm:$0xff]  ;;  %v770_v21 = vld [vmem:[#allocation6 + $0x70] sm:$0xff]  ;;  %v771_v22 = vld [vmem:[#allocation6 + $0x78] sm:$0xff] }
 0x117   : > { %3032 = vmatprep.subr.bf16.mxu1 %v3812_v0  ;;  %v774_v49 = vld [vmem:[#allocation2] sm:$0xf0]  ;;  %v775_v50 = vld [vmem:[#allocation2 + $0x18] sm:$0xf]  ;;  %v4298_v20 = vpack.c.bf16 %v769_v19, %v768_v18  ;;  %v4307_v23 = vpack.c.bf16 %v771_v22, %v770_v21  ;;  %v2320_v26 = vld [vmem:[%s4579_s12] ss:$0 sm:$0xff] }
 0x118   : > { %v772_v52 = vld [vmem:[#allocation2] sm:$0xf8]  ;;  %v773_v53 = vld [vmem:[#allocation2 + $0x18] sm:$0x7]  ;;  %v811_v55 = vrot.slane %v774_v49, 4  ;;  %v812_v56 = vrot.slane %v775_v50, 4 }
 0x119   : > { %3010 = vmatpush3.bf16.msra.mxu0 %v3009_v32  ;;  %v888_v58 = vrot.slane %v772_v52, 3  ;;  %v889_v59 = vrot.slane %v773_v53, 3  ;;  %v1201_v35 = vld [vmem:[#allocation12 + $0x80] sm:$0xff]  ;;  %v1202_v36 = vld [vmem:[#allocation12 + $0x88] sm:$0xff]  ;;  %v1204_v48 = vld [vmem:[#allocation12 + $0x98] sm:$0xff] }
 0x11a   : > { %3034 = vmatpush3.bf16.msra.mxu1 %v3033_v33  ;;  %3011 = vmatprep.subr.bf16.mxu0 %v3812_v0  ;;  %v813_v62 = vsel %vm810_vm1, %v811_v55, %v812_v56  ;;  %v1169_v37 = vld [vmem:[#allocation11 + $0x80] sm:$0xff]  ;;  %v1186_v41 = vld [vmem:[#allocation12 + $0x8] sm:$0xff]  ;;  %v1171_v49 = vld [vmem:[#allocation11 + $0x90] sm:$0xff] }
 0x11b   : > { %3035 = vmatprep.subr.bf16.mxu1 %v3812_v0  ;;  %v890_v2 = vsel %vm887_vm2, %v888_v58, %v889_v59  ;;  %v1185_v40 = vld [vmem:[#allocation12] sm:$0xff]  ;;  %v1154_v45 = vld [vmem:[#allocation11 + $0x8] sm:$0xff]  ;;  %v1172_v51 = vld [vmem:[#allocation11 + $0x98] sm:$0xff] }
 0x11c   : > { %v3094_v43 = vpack.c.bf16 %v1186_v41, %v1185_v40  ;;  %v1187_v52 = vld [vmem:[#allocation12 + $0x10] sm:$0xff]  ;;  %v1188_v53 = vld [vmem:[#allocation12 + $0x18] sm:$0xff]  ;;  %v1205_v59 = vld [vmem:[#allocation12 + $0xa0] sm:$0xff] }
 0x11d   : > { %3013 = vmatpush3.bf16.msra.mxu0 %v3012_v38  ;;  %v3092_v38 = vpack.c.bf16 %v1202_v36, %v1201_v35  ;;  %v3098_v55 = vpack.c.bf16 %v1188_v53, %v1187_v52  ;;  %v1155_v56 = vld [vmem:[#allocation11 + $0x10] sm:$0xff]  ;;  %v1206_v60 = vld [vmem:[#allocation12 + $0xa8] sm:$0xff]  ;;  %v1173_v61 = vld [vmem:[#allocation11 + $0xa0] sm:$0xff] }
 0x11e   : > { %3037 = vmatpush3.bf16.msra.mxu1 %v3036_v39  ;;  %3014 = vmatprep.subr.bf16.mxu0 %v3812_v0  ;;  %v1170_v39 = vld [vmem:[#allocation11 + $0x88] sm:$0xff]  ;;  %v1189_v3 = vld [vmem:[#allocation12 + $0x20] sm:$0xff]  ;;  %v1207_v13 = vld [vmem:[#allocation12 + $0xb0] sm:$0xff] }
 0x11f   : > { %3038 = vmatprep.subr.bf16.mxu1 %v3812_v0  ;;  %v3124_v42 = vpack.c.bf16 %v1170_v39, %v1169_v37  ;;  %v1190_v4 = vld [vmem:[#allocation12 + $0x28] sm:$0xff]  ;;  %v1157_v9 = vld [vmem:[#allocation11 + $0x20] sm:$0xff]  ;;  %v1208_v15 = vld [vmem:[#allocation12 + $0xb8] sm:$0xff] }
 0x120   : > { %v3102_v7 = vpack.c.bf16 %v1190_v4, %v1189_v3  ;;  %v1158_v10 = vld [vmem:[#allocation11 + $0x28] sm:$0xff]  ;;  %v3104_v16 = vpack.c.bf16 %v1208_v15, %v1207_v13  ;;  %v1175_v18 = vld [vmem:[#allocation11 + $0xb0] sm:$0xff]  ;;  %v1176_v19 = vld [vmem:[#allocation11 + $0xb8] sm:$0xff] }
 0x121   : > { %3016 = vmatpush3.bf16.msra.mxu0 %v3015_v44  ;;  %v1153_v44 = vld [vmem:[#allocation11] sm:$0xff]  ;;  %v3134_v12 = vpack.c.bf16 %v1158_v10, %v1157_v9  ;;  %v1191_v21 = vld [vmem:[#allocation12 + $0x30] sm:$0xff]  ;;  %v3136_v22 = vpack.c.bf16 %v1176_v19, %v1175_v18  ;;  %v1194_v37 = vld [vmem:[#allocation12 + $0x48] sm:$0xff] }
 0x122   : > { %3040 = vmatpush3.bf16.msra.mxu1 %v3039_v47  ;;  %3017 = vmatprep.subr.bf16.mxu0 %v3812_v0  ;;  %v3126_v46 = vpack.c.bf16 %v1154_v45, %v1153_v44  ;;  %v1203_v47 = vld [vmem:[#allocation12 + $0x90] sm:$0xff]  ;;  %v1193_v35 = vld [vmem:[#allocation12 + $0x40] sm:$0xff]  ;;  %v1162_v39 = vld [vmem:[#allocation11 + $0x48] sm:$0xff] }
 0x123   : > { %3041 = vmatprep.subr.bf16.mxu1 %v3812_v0  ;;  %v3096_v50 = vpack.c.bf16 %v1204_v48, %v1203_v47  ;;  %v3110_v40 = vpack.c.bf16 %v1194_v37, %v1193_v35  ;;  %v1179_v44 = vld [vmem:[#allocation11 + $0xd0] sm:$0xff]  ;;  %v1196_v48 = vld [vmem:[#allocation12 + $0x58] sm:$0xff]  ;;  %v1166_v3 = vld [vmem:[#allocation11 + $0x68] sm:$0xff] }
 0x124   : > { %v1195_v47 = vld [vmem:[#allocation12 + $0x50] sm:$0xff]  ;;  %v1164_v52 = vld [vmem:[#allocation11 + $0x58] sm:$0xff] }
 0x125   : > { %3019 = vmatpush3.bf16.msra.mxu0 %v3018_v54  ;;  %v3128_v54 = vpack.c.bf16 %v1172_v51, %v1171_v49  ;;  %v1163_v51 = vld [vmem:[#allocation11 + $0x50] sm:$0xff]  ;;  %v1184_v10 = vld [vmem:[#allocation11 + $0xf8] sm:$0xff] }
 0x126   : > { %3043 = vmatpush3.bf16.msra.mxu1 %v3042_v57  ;;  %3044 = vmatprep.subr.bf16.mxu0 %v3812_v0  ;;  %v1156_v57 = vld [vmem:[#allocation11 + $0x18] sm:$0xff]  ;;  %v3146_v53 = vpack.c.bf16 %v1164_v52, %v1163_v51  ;;  %v1215_v4 = vld [vmem:[#allocation12 + $0xf0] sm:$0xff] }
 0x127   : > { %3068 = vmatprep.subr.bf16.mxu1 %v3812_v0  ;;  %v3130_v58 = vpack.c.bf16 %v1156_v57, %v1155_v56  ;;  %v1181_v56 = vld [vmem:[#allocation11 + $0xe0] sm:$0xff]  ;;  %v1183_v9 = vld [vmem:[#allocation11 + $0xf0] sm:$0xff]  ;;  %v1168_v19 = vld [vmem:[#allocation11 + $0x78] sm:$0xff] }
 0x128   : > { %2679 = vmatmul.mubr.f32.vlgmr.msra.gmra.mrb[0].mxu0 %v813_v62  ;;  %v3100_v62 = vpack.c.bf16 %v1206_v60, %v1205_v59  ;;  %v1197_v59 = vld [vmem:[#allocation12 + $0x60] sm:$0xff]  ;;  %v1198_v60 = vld [vmem:[#allocation12 + $0x68] sm:$0xff]  ;;  %v3152_v13 = vpack.c.bf16 %v1184_v10, %v1183_v9  ;;  %v1199_v15 = vld [vmem:[#allocation12 + $0x70] sm:$0xff] }
 0x129   : > { %2714 = vmatmul.mubr.f32.vlgmr.msra.gmra.mrb[0].mxu1 %v890_v2  ;;  %3046 = vmatpush3.bf16.msra.mxu0 %v4259_v63  ;;  %v1174_v2 = vld [vmem:[#allocation11 + $0xa8] sm:$0xff]  ;;  %v1167_v18 = vld [vmem:[#allocation11 + $0x70] sm:$0xff]  ;;  %v1622_v9 = vld [vmem:[#allocation15] sm:$0xff] }
 0x12a   : > { %3047 = vmatprep.subr.bf16.mxu0 %v3812_v0  ;;  %2748 = vmatprep.mubr.msk.f32.mxu0 %vm3814_vm0, %v3813_v1  ;;  %v3132_v6 = vpack.c.bf16 %v1174_v2, %v1173_v61  ;;  %v1165_v2 = vld [vmem:[#allocation11 + $0x60] sm:$0xff]  ;;  %v1623_v10 = vld [vmem:[#allocation15 + $0x8] sm:$0xff] }
 0x12b   : > { %3070 = vmatpush3.bf16.msra.mxu1 %v4259_v63  ;;  %2783 = vmatprep.mubr.msk.f32.mxu1 %vm3814_vm0, %v3813_v1 }
 0x12c   : > { %3071 = vmatprep.subr.bf16.mxu1 %v3812_v0 }
 0x12d   : > { %3049 = vmatpush3.bf16.msra.mxu0 %v4264_v5 }
 0x12e   : > { %3050 = vmatprep.subr.bf16.mxu0 %v3812_v0 }
 0x12f   : > { %3073 = vmatpush3.bf16.msra.mxu1 %v4264_v5 }
 0x130   : > { %3074 = vmatprep.subr.bf16.mxu1 %v3812_v0 }
 0x131   : > { %3052 = vmatpush3.bf16.msra.mxu0 %v4274_v8 }
 0x132   : > { %3053 = vmatprep.subr.bf16.mxu0 %v3812_v0 }
 0x133   : > { %3076 = vmatpush3.bf16.msra.mxu1 %v4274_v8 }
 0x134   : > { %3077 = vmatprep.subr.bf16.mxu1 %v3812_v0 }
 0x135   : > { %3055 = vmatpush3.bf16.msra.mxu0 %v4280_v11 }
 0x136   : > { %3056 = vmatprep.subr.bf16.mxu0 %v3812_v0 }
 0x137   : > { %3079 = vmatpush3.bf16.msra.mxu1 %v4280_v11 }
 0x138   : > { %3080 = vmatprep.subr.bf16.mxu1 %v3812_v0 }
 0x139   : > { %3058 = vmatpush3.bf16.msra.mxu0 %v4286_v14 }
 0x13a   : > { %3059 = vmatprep.subr.bf16.mxu0 %v3812_v0 }
 0x13b   : > { %3082 = vmatpush3.bf16.msra.mxu1 %v4286_v14 }
 0x13c   : > { %3083 = vmatprep.subr.bf16.mxu1 %v3812_v0 }
 0x13d   : > { %3061 = vmatpush3.bf16.msra.mxu0 %v4292_v17 }
 0x13e   : > { %3062 = vmatprep.subr.bf16.mxu0 %v3812_v0 }
 0x13f   : > { %3085 = vmatpush3.bf16.msra.mxu1 %v4292_v17 }
 0x140   : > { %3086 = vmatprep.subr.bf16.mxu1 %v3812_v0 }
 0x141   : > { %3064 = vmatpush3.bf16.msra.mxu0 %v4298_v20 }
 0x142   : > { %3065 = vmatprep.subr.bf16.mxu0 %v3812_v0 }
 0x143   : > { %3088 = vmatpush3.bf16.msra.mxu1 %v4298_v20 }
 0x144   : > { %3089 = vmatprep.subr.bf16.mxu1 %v3812_v0 }
 0x145   : > { %3067 = vmatpush3.bf16.msra.mxu0 %v4307_v23 }
 0x146   : > { %3093 = vmatprep.subr.bf16.mxu0 %v3092_v38  ;;  %v1161_v38 = vld [vmem:[#allocation11 + $0x40] sm:$0xff] }
 0x147   : > { %3091 = vmatpush3.bf16.msra.mxu1 %v4307_v23  ;;  %v3142_v41 = vpack.c.bf16 %v1162_v39, %v1161_v38  ;;  %v1149_v38 = vld [vmem:[#allocation2] sm:$0xf0]  ;;  %v1151_v39 = vld [vmem:[#allocation2 + $0x18] sm:$0xf] }
 0x148   : > { %3125 = vmatprep.subr.bf16.mxu1 %v3124_v42  ;;  %v1211_v42 = vld [vmem:[#allocation12 + $0xd0] sm:$0xff] }
 0x1fb   : > { %v881_v24 = vpop.f32.mrb[0].mxu0 }
 0x1fc   : > { %v958_v25 = vpop.f32.mrb[0].mxu1  ;;  %v2680_v27 = vpop.f32.mrb[1].mxu0 }
 0x1fd   : > { %v959_v28 = vadd.f32 %v958_v25, %v881_v24  ;;  %v2715_v29 = vpop.f32.mrb[1].mxu1  ;;  %v1192_v24 = vld [vmem:[#allocation12 + $0x38] sm:$0xff]  ;;  %v1159_v25 = vld [vmem:[#allocation11 + $0x30] sm:$0xff] }
 0x1fe   : > { %v1160_v27 = vld [vmem:[#allocation11 + $0x38] sm:$0xff]  ;;  %v1209_v29 = vld [vmem:[#allocation12 + $0xc0] sm:$0xff] }
 0x1ff   : > { %v969_v30 = vadd.f32 %v2320_v26, %v959_v28  ;;  %v3106_v26 = vpack.c.bf16 %v1192_v24, %v1191_v21  ;;  %v3138_v28 = vpack.c.bf16 %v1160_v27, %v1159_v25 }
 0x201   : > { %2749 = vmatmul.mubr.f32.vlgmr.msra.gmra.mrb[2].mxu0 %v969_v30 }
 0x202   : > { %3095 = vmatpush3.bf16.msra.mxu0 %v3094_v43  ;;  %v1212_v43 = vld [vmem:[#allocation12 + $0xd8] sm:$0xff] }
 0x203   : > { %3097 = vmatprep.subr.bf16.mxu0 %v3096_v50  ;;  %v3112_v45 = vpack.c.bf16 %v1212_v43, %v1211_v42  ;;  %v3114_v50 = vpack.c.bf16 %v1196_v48, %v1195_v47  ;;  %v1222_v42 = vrot.slane %v1151_v39, 4  ;;  %v1628_v39 = vld [vmem:[#allocation15 + $0x30] sm:$0xff] }
 0x206   : > { %3099 = vmatpush3.bf16.msra.mxu0 %v3098_v55  ;;  %v1214_v55 = vld [vmem:[#allocation12 + $0xe8] sm:$0xff] }
 0x207   : > { %3101 = vmatprep.subr.bf16.mxu0 %v3100_v62  ;;  %v3118_v62 = vpack.c.bf16 %v1198_v60, %v1197_v59 }
 0x20a   : > { %3103 = vmatpush3.bf16.msra.mxu0 %v3102_v7  ;;  %v1216_v7 = vld [vmem:[#allocation12 + $0xf8] sm:$0xff] }
 0x20b   : > { %3105 = vmatprep.subr.bf16.mxu0 %v3104_v16  ;;  %v1200_v16 = vld [vmem:[#allocation12 + $0x78] sm:$0xff] }
 0x20c   : > { %v3122_v21 = vpack.c.bf16 %v1200_v16, %v1199_v15  ;;  %v1641_v15 = vld [vmem:[#allocation15 + $0x98] sm:$0xff] }
 0x20e   : > { %3107 = vmatpush3.bf16.msra.mxu0 %v3106_v26 }
 0x2d4   : > { %v1036_v31 = vpop.f32.mrb[2].mxu0 }
 0x2d5   : > { %v4314_v32 = vsub.f32 %v969_v30, %v1036_v31  ;;  %v2750_v33 = vpop.f32.mrb[3].mxu0  ;;  %v1210_v30 = vld [vmem:[#allocation12 + $0xc8] sm:$0xff]  ;;  %v1177_v31 = vld [vmem:[#allocation11 + $0xc0] sm:$0xff] }
 0x2d6   : > { %v3108_v33 = vpack.c.bf16 %v1210_v30, %v1209_v29  ;;  %v2322_v30 = vld [vmem:[%s4581_s6] ss:$0 sm:$0xff] }
 0x2d7   : > { %v1041_v34 = vmul.f32 %v4314_v32, %v4314_v32 }
 0x2d8   : > { %3109 = vmatprep.subr.bf16.mxu0 %v3108_v33  ;;  %v2323_v33 = vld [vmem:[%s4518_s7] ss:$0 sm:$0xff] }
 0x2d9   : > { %2784 = vmatmul.mubr.f32.vlgmr.msra.gmra.mrb[2].mxu1 %v1041_v34  ;;  %v1178_v34 = vld [vmem:[#allocation11 + $0xc8] sm:$0xff]  ;;  %3111 = vmatpush3.bf16.msra.mxu0 %v3110_v40  ;;  %v1145_v40 = vld [vmem:[#allocation2] sm:$0xfc] }
 0x2da   : > { %3127 = vmatpush3.bf16.msra.mxu1 %v3126_v46  ;;  %v3140_v36 = vpack.c.bf16 %v1178_v34, %v1177_v31  ;;  %v1180_v46 = vld [vmem:[#allocation11 + $0xd8] sm:$0xff]  ;;  %3113 = vmatprep.subr.bf16.mxu0 %v3112_v45  ;;  %v1304_v43 = vrot.slane %v1145_v40, 2 }
 0x2db   : > { %3129 = vmatprep.subr.bf16.mxu1 %v3128_v54  ;;  %v3144_v49 = vpack.c.bf16 %v1180_v46, %v1179_v44  ;;  %v1213_v54 = vld [vmem:[#allocation12 + $0xe0] sm:$0xff]  ;;  %v1629_v40 = vld [vmem:[#allocation15 + $0x38] sm:$0xff] }
 0x2dc   : > { %v3116_v57 = vpack.c.bf16 %v1214_v55, %v1213_v54 }
 0x2dd   : > { %3115 = vmatpush3.bf16.msra.mxu0 %v3114_v50 }
 0x2de   : > { %3131 = vmatpush3.bf16.msra.mxu1 %v3130_v58  ;;  %v1182_v58 = vld [vmem:[#allocation11 + $0xe8] sm:$0xff]  ;;  %3117 = vmatprep.subr.bf16.mxu0 %v3116_v57  ;;  %v1638_v57 = vld [vmem:[#allocation15 + $0x80] sm:$0xff] }
 0x2df   : > { %3133 = vmatprep.subr.bf16.mxu1 %v3132_v6  ;;  %v3148_v61 = vpack.c.bf16 %v1182_v58, %v1181_v56  ;;  %v3150_v6 = vpack.c.bf16 %v1166_v3, %v1165_v2  ;;  %v1639_v58 = vld [vmem:[#allocation15 + $0x88] sm:$0xff] }
 0x2e0   : > { %v3204_v59 = vpack.c.bf16 %v1639_v58, %v1638_v57  ;;  %v1635_v57 = vld [vmem:[#allocation15 + $0x68] sm:$0xff]  ;;  %v1652_v58 = vld [vmem:[#allocation15 + $0xf0] sm:$0xff] }
 0x2e1   : > { %3119 = vmatpush3.bf16.msra.mxu0 %v3118_v62 }
 0x2e2   : > { %3135 = vmatpush3.bf16.msra.mxu1 %v3134_v12  ;;  %v3120_v12 = vpack.c.bf16 %v1216_v7, %v1215_v4 }
 0x2e3   : > { %3137 = vmatprep.subr.bf16.mxu1 %v3136_v22  ;;  %v3154_v22 = vpack.c.bf16 %v1168_v19, %v1167_v18 }
 0x2e4   : > { %3121 = vmatprep.subr.bf16.mxu0 %v3120_v12  ;;  %v2324_v12 = vld [vmem:[%s4582_s26] ss:$0 sm:$0xff]  ;;  %s2333_s26 = sshll.u32 %s3942_s3, 7  ;;  %s3815_s3 = smov [#allocation17]  }
 0x2e5   : > { %3123 = vmatpush3.bf16.msra.mxu0 %v3122_v21  ;;  %v3206_v21 = vpack.c.bf16 %v1623_v10, %v1622_v9 }
 0x2e6   : > { %3139 = vmatpush3.bf16.msra.mxu1 %v3138_v28  ;;  %3156 = vmatprep.subr.bf16.mxu0 %v3812_v0  ;;  %v2321_v28 = vld [vmem:[%s4580_s5] ss:$0 sm:$0xff] }
 0x2e7   : > { %3141 = vmatprep.subr.bf16.mxu1 %v3140_v36 }
 0x2ea   : > { %3143 = vmatpush3.bf16.msra.mxu1 %v3142_v41  ;;  %v1147_v41 = vld [vmem:[#allocation2 + $0x18] sm:$0x3] }
 0x2eb   : > { %3145 = vmatprep.subr.bf16.mxu1 %v3144_v49  ;;  %v1305_v44 = vrot.slane %v1147_v41, 2  ;;  %v1646_v41 = vld [vmem:[#allocation15 + $0xc0] sm:$0xff] }
 0x2ed   : > { %v1306_v55 = vsel %vm1303_vm4, %v1304_v43, %v1305_v44  ;;  %v1630_v44 = vld [vmem:[#allocation15 + $0x40] sm:$0xff] }
 0x2ee   : > { %3147 = vmatpush3.bf16.msra.mxu1 %v3146_v53 }
 0x2ef   : > { %3149 = vmatprep.subr.bf16.mxu1 %v3148_v61 }
 0x2f2   : > { %3151 = vmatpush3.bf16.msra.mxu1 %v3150_v6 }
 0x2f3   : > { %3153 = vmatprep.subr.bf16.mxu1 %v3152_v13  ;;  %v1640_v13 = vld [vmem:[#allocation15 + $0x90] sm:$0xff] }
 0x2f6   : > { %3155 = vmatpush3.bf16.msra.mxu1 %v3154_v22 }
 0x2f7   : > { %3180 = vmatprep.subr.bf16.mxu1 %v3812_v0 }
 0x3ac   : > { %v1108_v24 = vpop.f32.mrb[2].mxu1 }
 0x3ad   : > { %v1109_v25 = vadd.f32 1e-05, %v1108_v24  ;;  %v2785_v26 = vpop.f32.mrb[3].mxu1  ;;  %v3208_v24 = vpack.c.bf16 %v1641_v15, %v1640_v13 }
 0x3ae   : > { %v1625_v26 = vld [vmem:[#allocation15 + $0x18] sm:$0xff] }
 0x3af   : > { %3486 = vrsqrt.f32 %v1109_v25  ;;  %v1624_v25 = vld [vmem:[#allocation15 + $0x10] sm:$0xff] }
 0x3b9   : > { %v3487_v27 = vpop.eup %3486 }
 0x3ba   : > { %v1113_v29 = vmul.f32 %v3487_v27, %v4314_v32  ;;  %v1221_v32 = vrot.slane %v1149_v38, 4  ;;  %v1642_v27 = vld [vmem:[#allocation15 + $0xa0] sm:$0xff] }
 0x3bc   : > { %v1121_v31 = vmul.f32 %v2321_v28, %v1113_v29  ;;  %v1223_v53 = vsel %vm810_vm1, %v1221_v32, %v1222_v42  ;;  %v1643_v28 = vld [vmem:[#allocation15 + $0xa8] sm:$0xff]  ;;  %v3218_v42 = vpack.c.bf16 %v1629_v40, %v1628_v39  ;;  %v1594_v40 = vld [vmem:[#allocation14 + $0xa0] sm:$0xff] }
 0x3bd   : > { %v1647_v32 = vld [vmem:[#allocation15 + $0xc8] sm:$0xff] }
 0x3be   : > { %v1129_v34 = vadd.f32 %v2322_v30, %v1121_v31  ;;  %v3210_v30 = vpack.c.bf16 %v1625_v26, %v1624_v25  ;;  %v3212_v31 = vpack.c.bf16 %v1643_v28, %v1642_v27  ;;  %v3220_v43 = vpack.c.bf16 %v1647_v32, %v1646_v41  ;;  %v1654_v25 = vld [vmem:[#allocation15 + $0x100] sm:$0xff]  ;;  %v1655_v26 = vld [vmem:[#allocation15 + $0x108] sm:$0xff] }
 0x3bf   : > { %v1574_v27 = vld [vmem:[#allocation14] sm:$0xff]  ;;  %v3237_v28 = vpack.c.bf16 %v1655_v26, %v1654_v25  ;;  %v1595_v41 = vld [vmem:[#allocation14 + $0xa8] sm:$0xff] }
 0x3c0   : > { %vm1130_vm3 = vcmp.ge.f32.partialorder %v1129_v34, 0.0  ;;  %v1138_v35 = vmul.f32 %v2323_v33, %v1129_v34  ;;  %v1626_v33 = vld [vmem:[#allocation15 + $0x20] sm:$0xff]  ;;  %v3268_v32 = vpack.c.bf16 %v1595_v41, %v1594_v40 }
 0x3c1   : > { %v1666_v25 = vld [vmem:[#allocation15 + $0x160] sm:$0xff] }
 0x3c2   : > { %v1139_v36 = vsel %vm1130_vm3, %v1129_v34, %v1138_v35  ;;  %v1627_v34 = vld [vmem:[#allocation15 + $0x28] sm:$0xff]  ;;  %v1644_v35 = vld [vmem:[#allocation15 + $0xb0] sm:$0xff]  ;;  %v1565_v41 = vld [vmem:[#allocation2] sm:$0xff] }
 0x3c3   : > { %v1141_v37 = vrot.slane %v1139_v36, 4  ;;  %v1645_v36 = vld [vmem:[#allocation15 + $0xb8] sm:$0xff] }
 0x3c4   : > { %v3216_v38 = vpack.c.bf16 %v1645_v36, %v1644_v35  ;;  %v1657_v35 = vld [vmem:[#allocation15 + $0x118] sm:$0xff]  ;;  %v1576_v36 = vld [vmem:[#allocation14 + $0x10] sm:$0xff] }
 0x3c5   : > { %1143 = vst [vmem:[#allocation2 + $0x20] ss:$-20 sps:$4 sm:$0xff] %v1141_v37   ;;  %v3214_v37 = vpack.c.bf16 %v1627_v34, %v1626_v33  ;;  %v1656_v34 = vld [vmem:[#allocation15 + $0x110] sm:$0xff] }
 0x3cc   : > { %v1150_v45 = vld [vmem:[#allocation2 + $0x8] sm:$0xf0]  ;;  %v1152_v46 = vld [vmem:[#allocation2 + $0x20] sm:$0xf] }
 0x3cd   : > { %v1146_v47 = vld [vmem:[#allocation2 + $0x8] sm:$0xfc]  ;;  %v1224_v48 = vrot.slane %v1150_v45, 4  ;;  %v1225_v49 = vrot.slane %v1152_v46, 4  ;;  %v1148_v50 = vld [vmem:[#allocation2 + $0x20] sm:$0x3] }
 0x3ce   : > { %v1307_v51 = vrot.slane %v1146_v47, 2  ;;  %v1308_v52 = vrot.slane %v1148_v50, 2  ;;  %v1569_v4 = vld [vmem:[#allocation2 + $0x8] sm:$0xf0]  ;;  %v1572_v6 = vld [vmem:[#allocation2 + $0x20] sm:$0xf] }
 0x3cf   : > { %v1226_v54 = vsel %vm810_vm1, %v1224_v48, %v1225_v49  ;;  %v1679_v18 = vrot.slane %v1569_v4, 4  ;;  %v1680_v19 = vrot.slane %v1572_v6, 4  ;;  %v1631_v45 = vld [vmem:[#allocation15 + $0x48] sm:$0xff]  ;;  %v1648_v46 = vld [vmem:[#allocation15 + $0xd0] sm:$0xff]  ;;  %v1649_v47 = vld [vmem:[#allocation15 + $0xd8] sm:$0xff] }
 0x3d0   : > { %1293 = vmatprep.mubr.f32.mxu0 %v1226_v54  ;;  %v1309_v56 = vsel %vm1303_vm4, %v1307_v51, %v1308_v52  ;;  %v3222_v48 = vpack.c.bf16 %v1631_v45, %v1630_v44  ;;  %v3224_v49 = vpack.c.bf16 %v1649_v47, %v1648_v46  ;;  %v1632_v50 = vld [vmem:[#allocation15 + $0x50] sm:$0xff]  ;;  %v1633_v51 = vld [vmem:[#allocation15 + $0x58] sm:$0xff]  ;;  %v1650_v52 = vld [vmem:[#allocation15 + $0xe0] sm:$0xff] }
 0x3d1   : > { %1376 = vmatprep.mubr.f32.mxu1 %v1309_v56  ;;  %1294 = vmatmul.mubr.f32.vlgmr.msra.gmra.mrb[4].mxu0 %v1223_v53  ;;  %v1681_v29 = vsel %vm810_vm1, %v1679_v18, %v1680_v19  ;;  %v1651_v53 = vld [vmem:[#allocation15 + $0xe8] sm:$0xff]  ;;  %v3226_v54 = vpack.c.bf16 %v1633_v51, %v1632_v50  ;;  %v1634_v56 = vld [vmem:[#allocation15 + $0x60] sm:$0xff]  ;;  %v1571_v4 = vld [vmem:[#allocation2 + $0x18] sm:$0xf] }
 0x3d2   : > { %1377 = vmatmul.mubr.f32.vlgmr.msra.gmra.mrb[4].mxu1 %v1306_v55  ;;  %3158 = vmatpush3.bf16.msra.mxu0 %v4259_v63  ;;  %v3228_v55 = vpack.c.bf16 %v1651_v53, %v1650_v52  ;;  %v1677_v9 = vrot.slane %v1571_v4, 4  ;;  %v1590_v19 = vld [vmem:[#allocation14 + $0x80] sm:$0xff]  ;;  %v1579_v46 = vld [vmem:[#allocation14 + $0x28] sm:$0xff]  ;;  %v1660_v51 = vld [vmem:[#allocation15 + $0x130] sm:$0xff] }
 0x3d3   : > { %3159 = vmatprep.subr.bf16.mxu0 %v3812_v0  ;;  %2818 = vmatprep.mubr.msk.f32.mxu0 %vm3814_vm0, %v3813_v1  ;;  %v1578_v44 = vld [vmem:[#allocation14 + $0x20] sm:$0xff]  ;;  %v1661_v52 = vld [vmem:[#allocation15 + $0x138] sm:$0xff] }
 0x3d4   : > { %3182 = vmatpush3.bf16.msra.mxu1 %v4259_v63  ;;  %2853 = vmatprep.mubr.msk.f32.mxu1 %vm3814_vm0, %v3813_v1  ;;  %v3270_v47 = vpack.c.bf16 %v1579_v46, %v1578_v44  ;;  %v3246_v53 = vpack.c.bf16 %v1661_v52, %v1660_v51  ;;  %v2327_v52 = vld [vmem:[%s4585_s2] ss:$0 sm:$0xff] }
 0x3d5   : > { %3183 = vmatprep.subr.bf16.mxu1 %v3812_v0 }
 0x3d6   : > { %3161 = vmatpush3.bf16.msra.mxu0 %v4264_v5 }
 0x3d7   : > { %3162 = vmatprep.subr.bf16.mxu0 %v3812_v0 }
 0x3d8   : > { %3185 = vmatpush3.bf16.msra.mxu1 %v4264_v5 }
 0x3d9   : > { %3186 = vmatprep.subr.bf16.mxu1 %v3812_v0 }
 0x3da   : > { %3164 = vmatpush3.bf16.msra.mxu0 %v4274_v8 }
 0x3db   : > { %3165 = vmatprep.subr.bf16.mxu0 %v3812_v0 }
 0x3dc   : > { %3188 = vmatpush3.bf16.msra.mxu1 %v4274_v8 }
 0x3dd   : > { %3189 = vmatprep.subr.bf16.mxu1 %v3812_v0 }
 0x3de   : > { %3167 = vmatpush3.bf16.msra.mxu0 %v4280_v11 }
 0x3df   : > { %3168 = vmatprep.subr.bf16.mxu0 %v3812_v0 }
 0x3e0   : > { %3191 = vmatpush3.bf16.msra.mxu1 %v4280_v11 }
 0x3e1   : > { %3192 = vmatprep.subr.bf16.mxu1 %v3812_v0 }
 0x3e2   : > { %3170 = vmatpush3.bf16.msra.mxu0 %v4286_v14 }
 0x3e3   : > { %3171 = vmatprep.subr.bf16.mxu0 %v3812_v0 }
 0x3e4   : > { %3194 = vmatpush3.bf16.msra.mxu1 %v4286_v14 }
 0x3e5   : > { %3195 = vmatprep.subr.bf16.mxu1 %v3812_v0 }
 0x3e6   : > { %3173 = vmatpush3.bf16.msra.mxu0 %v4292_v17 }
 0x3e7   : > { %3174 = vmatprep.subr.bf16.mxu0 %v3812_v0 }
 0x3e8   : > { %3197 = vmatpush3.bf16.msra.mxu1 %v4292_v17 }
 0x3e9   : > { %3198 = vmatprep.subr.bf16.mxu1 %v3812_v0 }
 0x3ea   : > { %3176 = vmatpush3.bf16.msra.mxu0 %v4298_v20 }
 0x3eb   : > { %3177 = vmatprep.subr.bf16.mxu0 %v3812_v0 }
 0x3ec   : > { %3200 = vmatpush3.bf16.msra.mxu1 %v4298_v20 }
 0x3ed   : > { %3201 = vmatprep.subr.bf16.mxu1 %v3812_v0 }
 0x3ee   : > { %3179 = vmatpush3.bf16.msra.mxu0 %v4307_v23 }
 0x3ef   : > { %3205 = vmatprep.subr.bf16.mxu0 %v3204_v59  ;;  %v1653_v59 = vld [vmem:[#allocation15 + $0xf8] sm:$0xff] }
 0x3f0   : > { %3203 = vmatpush3.bf16.msra.mxu1 %v4307_v23 }
 0x3f1   : > { %3236 = vmatprep.subr.bf16.mxu1 %v3812_v0 }
 0x4a4   : > { %v2436_v60 = vpop.f32.mrb[4].mxu0 }
 0x4a5   : > { %v2471_v61 = vpop.f32.mrb[4].mxu1  ;;  %v2437_v62 = vpop.f32.mrb[5].mxu0 }
 0x4a6   : > { %v2438_v2 = vadd.f32 %v2437_v62, %v2436_v60  ;;  %v2472_v3 = vpop.f32.mrb[5].mxu1  ;;  %v3230_v60 = vpack.c.bf16 %v1635_v57, %v1634_v56  ;;  %v3232_v62 = vpack.c.bf16 %v1653_v59, %v1652_v58  ;;  %v1598_v57 = vld [vmem:[#allocation14 + $0xc0] sm:$0xff]  ;;  %v1599_v58 = vld [vmem:[#allocation14 + $0xc8] sm:$0xff] }
 0x4a7   : > { %v2473_v7 = vadd.f32 %v2472_v3, %v2471_v61  ;;  %v1636_v61 = vld [vmem:[#allocation15 + $0x70] sm:$0xff]  ;;  %v1568_v3 = vld [vmem:[#allocation2] sm:$0xf0]  ;;  %v3276_v59 = vpack.c.bf16 %v1599_v58, %v1598_v57  ;;  %v1607_v58 = vld [vmem:[#allocation14 + $0x108] sm:$0xff] }
 0x4a8   : > { %v1606_v57 = vld [vmem:[#allocation14 + $0x100] sm:$0xff] }
 0x4a9   : > { %v1379_v16 = vadd.f32 %v2473_v7, %v2438_v2  ;;  %v1637_v2 = vld [vmem:[#allocation15 + $0x78] sm:$0xff]  ;;  %v1676_v7 = vrot.slane %v1568_v3, 4  ;;  %v1583_v3 = vld [vmem:[#allocation14 + $0x48] sm:$0xff] }
 0x4aa   : > { %v3234_v6 = vpack.c.bf16 %v1637_v2, %v1636_v61  ;;  %v1663_v61 = vld [vmem:[#allocation15 + $0x148] sm:$0xff] }
 0x4ab   : > { %v4370_v22 = vadd.f32 %v2324_v12, %v1379_v16  ;;  %v1678_v10 = vsel %vm810_vm1, %v1676_v7, %v1677_v9  ;;  %v1566_v12 = vld [vmem:[#allocation2 + $0x8] sm:$0xff]  ;;  %v1601_v7 = vld [vmem:[#allocation14 + $0xd8] sm:$0xff] }
 0x4ad   : > { %2819 = vmatmul.mubr.f32.vlgmr.msra.gmra.mrb[6].mxu0 %v4370_v22 }
 0x4ae   : > { %3207 = vmatpush3.bf16.msra.mxu0 %v3206_v21  ;;  %1752 = vmatprep.mubr.f32.mxu0 %v1681_v29  ;;  %v1591_v21 = vld [vmem:[#allocation14 + $0x88] sm:$0xff] }
 0x4af   : > { %3209 = vmatprep.subr.bf16.mxu0 %v3208_v24  ;;  %v3260_v24 = vpack.c.bf16 %v1591_v21, %v1590_v19  ;;  %v1575_v29 = vld [vmem:[#allocation14 + $0x8] sm:$0xff]  ;;  %v1602_v21 = vld [vmem:[#allocation14 + $0xe0] sm:$0xff] }
 0x4b2   : > { %3211 = vmatpush3.bf16.msra.mxu0 %v3210_v30  ;;  %v3262_v30 = vpack.c.bf16 %v1575_v29, %v1574_v27  ;;  %v1667_v27 = vld [vmem:[#allocation15 + $0x168] sm:$0xff] }
 0x4b3   : > { %3213 = vmatprep.subr.bf16.mxu0 %v3212_v31  ;;  %v1593_v31 = vld [vmem:[#allocation14 + $0x98] sm:$0xff]  ;;  %v1587_v29 = vld [vmem:[#allocation14 + $0x68] sm:$0xff] }
 0x4b6   : > { %3215 = vmatpush3.bf16.msra.mxu0 %v3214_v37  ;;  %v3240_v37 = vpack.c.bf16 %v1657_v35, %v1656_v34  ;;  %v1668_v34 = vld [vmem:[#allocation15 + $0x170] sm:$0xff] }
 0x4b7   : > { %3217 = vmatprep.subr.bf16.mxu0 %v3216_v38  ;;  %v1577_v38 = vld [vmem:[#allocation14 + $0x18] sm:$0xff] }
 0x4b8   : > { %v3266_v39 = vpack.c.bf16 %v1577_v38, %v1576_v36  ;;  %v1669_v36 = vld [vmem:[#allocation15 + $0x178] sm:$0xff] }
 0x4b9   : > { %v1589_v38 = vld [vmem:[#allocation14 + $0x78] sm:$0xff] }
 0x4ba   : > { %3219 = vmatpush3.bf16.msra.mxu0 %v3218_v42  ;;  %v1658_v42 = vld [vmem:[#allocation15 + $0x120] sm:$0xff] }
 0x4bb   : > { %3221 = vmatprep.subr.bf16.mxu0 %v3220_v43  ;;  %v1659_v43 = vld [vmem:[#allocation15 + $0x128] sm:$0xff] }
 0x4bc   : > { %v3243_v45 = vpack.c.bf16 %v1659_v43, %v1658_v42 }
 0x4be   : > { %3223 = vmatpush3.bf16.msra.mxu0 %v3222_v48  ;;  %v1596_v48 = vld [vmem:[#allocation14 + $0xb0] sm:$0xff] }
 0x4bf   : > { %3225 = vmatprep.subr.bf16.mxu0 %v3224_v49  ;;  %v1597_v49 = vld [vmem:[#allocation14 + $0xb8] sm:$0xff] }
 0x4c0   : > { %v3272_v50 = vpack.c.bf16 %v1597_v49, %v1596_v48  ;;  %v2325_v48 = vld [vmem:[%s4583_s20] ss:$0 sm:$0xff] }
 0x4c2   : > { %3227 = vmatpush3.bf16.msra.mxu0 %v3226_v54  ;;  %v1580_v54 = vld [vmem:[#allocation14 + $0x30] sm:$0xff] }
 0x4c3   : > { %3229 = vmatprep.subr.bf16.mxu0 %v3228_v55  ;;  %v1581_v55 = vld [vmem:[#allocation14 + $0x38] sm:$0xff] }
 0x4c4   : > { %v3274_v56 = vpack.c.bf16 %v1581_v55, %v1580_v54 }
 0x4c6   : > { %3231 = vmatpush3.bf16.msra.mxu0 %v3230_v60  ;;  %v1662_v60 = vld [vmem:[#allocation15 + $0x140] sm:$0xff] }
 0x4c7   : > { %3233 = vmatprep.subr.bf16.mxu0 %v3232_v62  ;;  %v1582_v62 = vld [vmem:[#allocation14 + $0x40] sm:$0xff]  ;;  %v3249_v2 = vpack.c.bf16 %v1663_v61, %v1662_v60 }
 0x4c8   : > { %v3278_v4 = vpack.c.bf16 %v1583_v3, %v1582_v62  ;;  %v3293_v62 = vpack.c.bf16 %v1607_v58, %v1606_v57  ;;  %v1609_v3 = vld [vmem:[#allocation14 + $0x118] sm:$0xff] }
 0x4ca   : > { %3235 = vmatpush3.bf16.msra.mxu0 %v3234_v6  ;;  %v1600_v6 = vld [vmem:[#allocation14 + $0xd0] sm:$0xff] }
 0x4cb   : > { %3261 = vmatprep.subr.bf16.mxu0 %v3260_v24  ;;  %v3280_v9 = vpack.c.bf16 %v1601_v7, %v1600_v6  ;;  %v1603_v24 = vld [vmem:[#allocation14 + $0xe8] sm:$0xff]  ;;  %v1610_v7 = vld [vmem:[#allocation14 + $0x120] sm:$0xff] }
 0x4cc   : > { %v3284_v26 = vpack.c.bf16 %v1603_v24, %v1602_v21  ;;  %v1616_v24 = vld [vmem:[#allocation14 + $0x150] sm:$0xff] }
 0x4cd   : > { %1753 = vmatmul.mubr.f32.vlgmr.msra.gmra.mrb[8].mxu0 %v1678_v10  ;;  %v1664_v10 = vld [vmem:[#allocation15 + $0x150] sm:$0xff] }
 0x4ce   : > { %1892 = vmatprep.mubr.f32.mxu0 %v1566_v12  ;;  %3263 = vmatpush3.bf16.msra.mxu0 %v3262_v30  ;;  %v1665_v12 = vld [vmem:[#allocation15 + $0x158] sm:$0xff]  ;;  %v3255_v30 = vpack.c.bf16 %v1667_v27, %v1666_v25  ;;  %v1618_v27 = vld [vmem:[#allocation14 + $0x160] sm:$0xff] }
 0x4cf   : > { %v1617_v25 = vld [vmem:[#allocation14 + $0x158] sm:$0xff] }
 0x580   : > { %v1456_v13 = vpop.f32.mrb[6].mxu0 }
 0x581   : > { %v4376_v15 = vsub.f32 %v4370_v22, %v1456_v13  ;;  %v2820_v16 = vpop.f32.mrb[7].mxu0  ;;  %v1592_v22 = vld [vmem:[#allocation14 + $0x90] sm:$0xff] }
 0x582   : > { %v3264_v33 = vpack.c.bf16 %v1593_v31, %v1592_v22  ;;  %v1584_v13 = vld [vmem:[#allocation14 + $0x50] sm:$0xff]  ;;  %v3252_v16 = vpack.c.bf16 %v1665_v12, %v1664_v10 }
 0x583   : > { %v1461_v18 = vmul.f32 %v4376_v15, %v4376_v15  ;;  %v1604_v31 = vld [vmem:[#allocation14 + $0xf0] sm:$0xff] }
 0x584   : > { %3265 = vmatprep.subr.bf16.mxu0 %v3264_v33  ;;  %v1605_v33 = vld [vmem:[#allocation14 + $0xf8] sm:$0xff]  ;;  %v1612_v12 = vld [vmem:[#allocation14 + $0x130] sm:$0xff] }
 0x585   : > { %2854 = vmatmul.mubr.f32.vlgmr.msra.gmra.mrb[6].mxu1 %v1461_v18  ;;  %3267 = vmatpush3.bf16.msra.mxu0 %v3266_v39  ;;  %v1585_v18 = vld [vmem:[#allocation14 + $0x58] sm:$0xff]  ;;  %v3288_v35 = vpack.c.bf16 %v1605_v33, %v1604_v31  ;;  %v3258_v39 = vpack.c.bf16 %v1669_v36, %v1668_v34 }
 0x586   : > { %2888 = vmatprep.mubr.msk.f32.mxu1 %vm3814_vm0, %v3813_v1  ;;  %3238 = vmatpush3.bf16.msra.mxu1 %v3237_v28  ;;  %v3282_v19 = vpack.c.bf16 %v1585_v18, %v1584_v13  ;;  %v1586_v28 = vld [vmem:[#allocation14 + $0x60] sm:$0xff]  ;;  %v1613_v13 = vld [vmem:[#allocation14 + $0x138] sm:$0xff] }
 0x587   : > { %3239 = vmatprep.subr.bf16.mxu1 %v3812_v0  ;;  %3269 = vmatprep.subr.bf16.mxu0 %v3268_v32  ;;  %v3286_v22 = vpack.c.bf16 %v1587_v29, %v1586_v28  ;;  %v1614_v18 = vld [vmem:[#allocation14 + $0x140] sm:$0xff]  ;;  %v1619_v28 = vld [vmem:[#allocation14 + $0x168] sm:$0xff] }
 0x588   : > { %v3311_v29 = vpack.c.bf16 %v1619_v28, %v1618_v27 }
 0x589   : > { %3271 = vmatpush3.bf16.msra.mxu0 %v3270_v47 }
 0x58a   : > { %3241 = vmatpush3.bf16.msra.mxu1 %v3240_v37  ;;  %3273 = vmatprep.subr.bf16.mxu0 %v3272_v50  ;;  %v1588_v37 = vld [vmem:[#allocation14 + $0x70] sm:$0xff]  ;;  %v2326_v50 = vld [vmem:[%s4584_s21] ss:$0 sm:$0xff] }
 0x58b   : > { %3242 = vmatprep.subr.bf16.mxu1 %v3812_v0  ;;  %v3290_v40 = vpack.c.bf16 %v1589_v38, %v1588_v37 }
 0x58d   : > { %3275 = vmatpush3.bf16.msra.mxu0 %v3274_v56 }
 0x58e   : > { %3244 = vmatpush3.bf16.msra.mxu1 %v3243_v45  ;;  %3277 = vmatprep.subr.bf16.mxu0 %v3276_v59 }
 0x58f   : > { %3245 = vmatprep.subr.bf16.mxu1 %v3812_v0 }
 0x591   : > { %3279 = vmatpush3.bf16.msra.mxu0 %v3278_v4 }
 0x592   : > { %3247 = vmatpush3.bf16.msra.mxu1 %v3246_v53  ;;  %3281 = vmatprep.subr.bf16.mxu0 %v3280_v9  ;;  %v1611_v9 = vld [vmem:[#allocation14 + $0x128] sm:$0xff] }
 0x593   : > { %3248 = vmatprep.subr.bf16.mxu1 %v3812_v0  ;;  %v3299_v10 = vpack.c.bf16 %v1611_v9, %v1610_v7 }
 0x595   : > { %3283 = vmatpush3.bf16.msra.mxu0 %v3282_v19  ;;  %v1615_v19 = vld [vmem:[#allocation14 + $0x148] sm:$0xff] }
 0x596   : > { %3250 = vmatpush3.bf16.msra.mxu1 %v3249_v2  ;;  %3285 = vmatprep.subr.bf16.mxu0 %v3284_v26  ;;  %v1608_v2 = vld [vmem:[#allocation14 + $0x110] sm:$0xff]  ;;  %v3305_v21 = vpack.c.bf16 %v1615_v19, %v1614_v18  ;;  %v3308_v26 = vpack.c.bf16 %v1617_v25, %v1616_v24 }
 0x597   : > { %3251 = vmatprep.subr.bf16.mxu1 %v3812_v0  ;;  %v3296_v6 = vpack.c.bf16 %v1609_v3, %v1608_v2 }
 0x599   : > { %3287 = vmatpush3.bf16.msra.mxu0 %v3286_v22  ;;  %v1621_v22 = vld [vmem:[#allocation14 + $0x178] sm:$0xff] }
 0x59a   : > { %3253 = vmatpush3.bf16.msra.mxu1 %v3252_v16  ;;  %3289 = vmatprep.subr.bf16.mxu0 %v3288_v35  ;;  %v3302_v16 = vpack.c.bf16 %v1613_v13, %v1612_v12 }
 0x59b   : > { %3254 = vmatprep.subr.bf16.mxu1 %v3812_v0 }
 0x59d   : > { %3291 = vmatpush3.bf16.msra.mxu0 %v3290_v40 }
 0x59e   : > { %3256 = vmatpush3.bf16.msra.mxu1 %v3255_v30  ;;  %3316 = vmatprep.subr.bf16.mxu0 %v3812_v0  ;;  %v1620_v30 = vld [vmem:[#allocation14 + $0x170] sm:$0xff] }
 0x59f   : > { %3257 = vmatprep.subr.bf16.mxu1 %v3812_v0  ;;  %v3314_v31 = vpack.c.bf16 %v1621_v22, %v1620_v30 }
 0x5a0   : > { %1893 = vmatmul.mubr.f32.vlgmr.msra.gmra.mrb[10].mxu0 %v1565_v41  ;;  %v2540_v32 = vpop.f32.mrb[8].mxu0 }
 0x5a1   : > { %3318 = vmatpush3.bf16.msra.mxu0 %v4259_v63  ;;  %2958 = vmatprep.mubr.msk.f32.mxu0 %vm3814_vm0, %v3813_v1  ;;  %v2541_v42 = vpop.f32.mrb[9].mxu0 }
 0x5a2   : > { %3259 = vmatpush3.bf16.msra.mxu1 %v3258_v39  ;;  %3319 = vmatprep.subr.bf16.mxu0 %v3812_v0  ;;  %v4408_v43 = vadd.f32 %v2541_v42, %v2540_v32 }
 0x5a3   : > { %3292 = vmatprep.subr.bf16.mxu1 %v3812_v0 }
 0x5a5   : > { %3321 = vmatpush3.bf16.msra.mxu0 %v4264_v5 }
 0x5a6   : > { %3322 = vmatprep.subr.bf16.mxu0 %v3812_v0 }
 0x5a9   : > { %3324 = vmatpush3.bf16.msra.mxu0 %v4274_v8 }
 0x5aa   : > { %3325 = vmatprep.subr.bf16.mxu0 %v3812_v0 }
 0x5ad   : > { %3327 = vmatpush3.bf16.msra.mxu0 %v4280_v11 }
 0x5ae   : > { %3328 = vmatprep.subr.bf16.mxu0 %v3812_v0 }
 0x5b1   : > { %3330 = vmatpush3.bf16.msra.mxu0 %v4286_v14 }
 0x5b2   : > { %3331 = vmatprep.subr.bf16.mxu0 %v3812_v0 }
 0x5b5   : > { %3333 = vmatpush3.bf16.msra.mxu0 %v4292_v17 }
 0x5b6   : > { %3334 = vmatprep.subr.bf16.mxu0 %v3812_v0 }
 0x5b9   : > { %3336 = vmatpush3.bf16.msra.mxu0 %v4298_v20 }
 0x5ba   : > { %3337 = vmatprep.subr.bf16.mxu0 %v3812_v0 }
 0x5bd   : > { %3339 = vmatpush3.bf16.msra.mxu0 %v4307_v23 }
 0x658   : > { %v1528_v44 = vpop.f32.mrb[6].mxu1 }
 0x659   : > { %v1529_v45 = vadd.f32 1e-05, %v1528_v44  ;;  %v2855_v46 = vpop.f32.mrb[7].mxu1 }
 0x65b   : > { %3488 = vrsqrt.f32 %v1529_v45  ;;  %v2330_v45 = vld [vmem:[%s4588_s0] ss:$0 sm:$0xff] }
 0x665   : > { %v3489_v47 = vpop.eup %3488 }
 0x666   : > { %v1533_v49 = vmul.f32 %v3489_v47, %v4376_v15  ;;  %v2331_v47 = vld [vmem:[%s4589_s17] ss:$0 sm:$0xff] }
 0x668   : > { %v1541_v51 = vmul.f32 %v2325_v48, %v1533_v49 }
 0x66a   : > { %v1549_v53 = vadd.f32 %v2326_v50, %v1541_v51 }
 0x66c   : > { %vm1550_vm5 = vcmp.ge.f32.partialorder %v1549_v53, 0.0  ;;  %v1558_v54 = vmul.f32 %v2327_v52, %v1549_v53 }
 0x66e   : > { %v1559_v55 = vsel %vm1550_vm5, %v1549_v53, %v1558_v54 }
 0x66f   : > { %v1561_v56 = vrot.slane %v1559_v55, 4 }
 0x671   : > { %1563 = vst [vmem:[#allocation2 + $0x28] ss:$-20 sps:$4 sm:$0xff] %v1561_v56  }
 0x678   : > { %v1570_v59 = vld [vmem:[#allocation2 + $0x10] sm:$0xf0]  ;;  %v1573_v60 = vld [vmem:[#allocation2 + $0x28] sm:$0xf] }
 0x679   : > { %v1682_v15 = vrot.slane %v1570_v59, 4  ;;  %v1683_v61 = vrot.slane %v1573_v60, 4  ;;  %v1567_v33 = vld [vmem:[#allocation2 + $0x10] sm:$0xff] }
 0x67b   : > { %v1684_v4 = vsel %vm810_vm1, %v1682_v15, %v1683_v61 }
 0x67c   : > { %2889 = vmatmul.mubr.f32.vlgmr.msra.gmra.mrb[8].mxu1 %v1684_v4 }
 0x67d   : > { %3294 = vmatpush3.bf16.msra.mxu1 %v3293_v62  ;;  %2923 = vmatprep.mubr.msk.f32.mxu1 %vm3814_vm0, %v3813_v1 }
 0x67e   : > { %3295 = vmatprep.subr.bf16.mxu1 %v3812_v0 }
 0x681   : > { %3297 = vmatpush3.bf16.msra.mxu1 %v3296_v6 }
 0x682   : > { %3298 = vmatprep.subr.bf16.mxu1 %v3812_v0 }
 0x685   : > { %3300 = vmatpush3.bf16.msra.mxu1 %v3299_v10 }
 0x686   : > { %3301 = vmatprep.subr.bf16.mxu1 %v3812_v0 }
 0x689   : > { %3303 = vmatpush3.bf16.msra.mxu1 %v3302_v16 }
 0x68a   : > { %3304 = vmatprep.subr.bf16.mxu1 %v3812_v0 }
 0x68d   : > { %3306 = vmatpush3.bf16.msra.mxu1 %v3305_v21 }
 0x68e   : > { %3307 = vmatprep.subr.bf16.mxu1 %v3812_v0 }
 0x691   : > { %3309 = vmatpush3.bf16.msra.mxu1 %v3308_v26 }
 0x692   : > { %3310 = vmatprep.subr.bf16.mxu1 %v3812_v0 }
 0x695   : > { %3312 = vmatpush3.bf16.msra.mxu1 %v3311_v29 }
 0x696   : > { %3313 = vmatprep.subr.bf16.mxu1 %v3812_v0 }
 0x699   : > { %3315 = vmatpush3.bf16.msra.mxu1 %v3314_v31 }
 0x69a   : > { %3340 = vmatprep.subr.bf16.mxu1 %v3812_v0 }
 0x69c   : > { %2924 = vmatmul.mubr.f32.vlgmr.msra.gmra.mrb[10].mxu1 %v1567_v33 }
 0x69d   : > { %3342 = vmatpush3.bf16.msra.mxu1 %v4259_v63  ;;  %2993 = vmatprep.mubr.msk.f32.mxu1 %vm3814_vm0, %v3813_v1  ;;  %v2592_v1 = vpop.f32.mrb[10].mxu0 }
 0x69e   : > { %3343 = vmatprep.subr.bf16.mxu1 %v3812_v0  ;;  %v2593_v63 = vpop.f32.mrb[11].mxu0 }
 0x6a1   : > { %3345 = vmatpush3.bf16.msra.mxu1 %v4264_v5  ;;  %v2594_v5 = vadd.f32 %v2593_v63, %v2592_v1 }
 0x6a2   : > { %3346 = vmatprep.subr.bf16.mxu1 %v3812_v0 }
 0x6a5   : > { %3348 = vmatpush3.bf16.msra.mxu1 %v4274_v8 }
 0x6a6   : > { %3349 = vmatprep.subr.bf16.mxu1 %v3812_v0 }
 0x6a9   : > { %3351 = vmatpush3.bf16.msra.mxu1 %v4280_v11 }
 0x6aa   : > { %3352 = vmatprep.subr.bf16.mxu1 %v3812_v0 }
 0x6ad   : > { %3354 = vmatpush3.bf16.msra.mxu1 %v4286_v14 }
 0x6ae   : > { %3355 = vmatprep.subr.bf16.mxu1 %v3812_v0 }
 0x6b1   : > { %3357 = vmatpush3.bf16.msra.mxu1 %v4292_v17  ;;  %v2328_v17 = vld [vmem:[%s4586_s13] ss:$0 sm:$0xff]  ;;  %s746_s13 = scalar_lea.vmem [#allocation17], %s2311_s18  ;;  %s3722_s18 = sshll.u32 %s3815_s3, 4  ;;  %s3723_s18 = int_to_ptr.vmem [resolvable:$false] %s3722_s18 }
 0x6b2   : > { %3358 = vmatprep.subr.bf16.mxu1 %v3812_v0  ;;  %s2161_s5 = sshll.u32 %s746_s13, 4  ;;  %s3724_s0 = scalar_lea.vmem %s3723_s18, 256  ;;  %s4469_s5 = int_to_ptr.vmem [resolvable:$true] %s2161_s5 }
 0x6b3   : > { %s3718_s21 = scalar_lea.vmem %s4469_s5, 128  ;;  %p3725_p2 = scmp.lt.s32.totalorder %s4469_s5, %s3723_s18 }
 0x6b4   : > { %p3719_p12 = scmp.ne.s32.totalorder %s4469_s5, %s3718_s21  ;;  %p3726_p3 = scmp.lt.s32.totalorder %s3724_s0, %s3718_s21 }
 0x6b5   : > { %3360 = vmatpush3.bf16.msra.mxu1 %v4298_v20 }
 0x6b6   : > { %3361 = vmatprep.subr.bf16.mxu1 %v3812_v0  ;;  %p3720_p13 = pnand %p3719_p12, %p4591_p1  ;;  %p3727_p6 = por %p3726_p3, %p3725_p2 }
 0x6b8   : > { %p3721_p0 = pneg %p3720_p13 }
 0x6b9   : > { %3363 = vmatpush3.bf16.msra.mxu1 %v4307_v23 }
 0x6ba   : > { %p3728_p10 = pnand %p3727_p6, %p3721_p0 }
 0x74f   : > { %v1824_v8 = vpop.f32.mrb[8].mxu1 }
 0x750   : > { %v1825_v11 = vadd.f32 %v4408_v43, %v1824_v8  ;;  %v2890_v34 = vpop.f32.mrb[9].mxu1  ;;  %v2329_v43 = vld [vmem:[%s4587_s4] ss:$0 sm:$0xff]  ;;  %s4590_s4 = sld [smem:[#allocation39_spill]] }
 0x752   : > { %v1895_v14 = vadd.f32 %v2594_v5, %v1825_v11 }
 0x756   : > { %s4467_s6 = scalar_lea.hbm %s4590_s4, %s2333_s26 }
 0x76f   : > { %v1964_v35 = vpop.f32.mrb[10].mxu1 }
 0x770   : > { %v1965_v36 = vadd.f32 %v1964_v35, %v1895_v14  ;;  %v2925_v37 = vpop.f32.mrb[11].mxu1 }
 0x772   : > { %v1975_v20 = vadd.f32 %v2328_v17, %v1965_v36 }
 0x774   : > { %2959 = vmatmul.mubr.f32.vlgmr.msra.gmra.mrb[12].mxu0 %v1975_v20 }
 0x847   : > { %v2042_v0 = vpop.f32.mrb[12].mxu0 }
 0x848   : > { %v2046_v23 = vsub.f32 %v1975_v20, %v2042_v0  ;;  %v2960_v38 = vpop.f32.mrb[13].mxu0 }
 0x84a   : > { %v2047_v39 = vmul.f32 %v2046_v23, %v2046_v23 }
 0x84c   : > { %2994 = vmatmul.mubr.f32.vlgmr.msra.gmra.mrb[12].mxu1 %v2047_v39 }
 0x91f   : > { %v2114_v40 = vpop.f32.mrb[12].mxu1 }
 0x920   : > { %v2115_v41 = vadd.f32 1e-05, %v2114_v40  ;;  %v2995_v32 = vpop.f32.mrb[13].mxu1 }
 0x922   : > { %3490 = vrsqrt.f32 %v2115_v41 }
 0x92c   : > { %v3491_v42 = vpop.eup %3490 }
 0x92d   : > { %v2119_v44 = vmul.f32 %v3491_v42, %v2046_v23 }
 0x92f   : > { %v2127_v46 = vmul.f32 %v2329_v43, %v2119_v44 }
 0x931   : > { %v2135_v48 = vadd.f32 %v2330_v45, %v2127_v46 }
 0x933   : > { %vm2136_vm6 = vcmp.ge.f32.partialorder %v2135_v48, 0.0  ;;  %v2144_v49 = vmul.f32 %v2331_v47, %v2135_v48 }
 0x935   : > { %v2145_v50 = vsel %vm2136_vm6, %v2135_v48, %v2144_v49 }
 0x936   : > { %2146 = vst [vmem:[%s746_s13] sm:$0xff] %v2145_v50 }
 0x937   : > { %3731 = shalt.err (!%p3728_p10)
}
 0x938   : > { %s3732_s16 = scalar_lea.hbm %s4467_s6, 128  ;;  %s3736_s17 = scalar_lea.hbm %s4590_s4, 256 }
 0x939   : > { %p3733_p11 = scmp.ne.s32.totalorder %s4467_s6, %s3732_s16  ;;  %p3737_p9 = scmp.lt.u32.totalorder %s4467_s6, %s4590_s4 }
 0x93a   : > { %p3738_p7 = scmp.lt.u32.totalorder %s3736_s17, %s3732_s16  ;;  %p3740_p12 = scmp.lt.u32.totalorder %s3732_s16, %s4467_s6 }
 0x93b   : > { %p3734_p8 = pnand %p3733_p11, %p4591_p1 }
 0x93c   : > { %p3739_p4 = por %p3738_p7, %p3737_p9 }
 0x93d   : > { %p3735_p5 = pneg %p3734_p8 }
 0x93e   : > { %p3741_p13 = por %p3740_p12, %p3739_p4 }
 0x940   : > { %p3742_p0 = pnand %p3741_p13, %p3735_p5 }
 0x942   : > { %3745 = shalt.err (!%p3742_p0)
}
 0x943   : > { %3394 = dma.vmem_to_hbm [thread:$0]  (%p4591_p1), %s4469_s5, 128, %s4467_s6, %s2148_s30  }
 0x944 PF: > { %s2173_s12 = sand.u32 1, %s3788_s1   ;;  %p4592_p2 = scmp.ne.s32.totalorder %s4567_s11, 0 }
 0x945   : > { %p4593_p3 = scmp.ge.s32.totalorder %s3800_s24, 2  ;;  %s2174_s20 = scalar_lea.sflag [#allocation5], %s2173_s12 }
 0x947   : > { %p3423_p6 = pnand %p4593_p3, %p4592_p2 }
 0x949   : > { %3783 = dma.done.wait (!%p3423_p6), %s2174_s20, 128  }
 0x94a   : > { %3785 = vsyncadd (!%p3423_p6), %s2174_s20, 4294967168  ;;  %p37_p10 = scmp.ge.s32.totalorder %s4136_s27, 4   ;;  %s4594_s1 = smov %s3792_s22 }
 0x94b   : > { %s4595_s22 = smov %s3796_s23  ;;  %s4596_s23 = smov %s4148_s10 }
 0x94c   : > { %s4597_s24 = smov %s4136_s27  ;;  %39 = sbr.rel (!%p37_p10) target bundleno = 26 (0x1a), region = 173 }
 0x953   :  { %2179 = vsyncpa [#allocation4], 1 }
 0x954   :  { %2181 = vsyncpa [#allocation4 + $0x1], 1 }
 0x955   :  { %2182 = vsyncpa [#allocation7], 1 }
 0x956   :  { %2183 = vsyncpa [#allocation10], 1 }
 0x957   :  { %2184 = vsyncpa [#allocation13], 1 }
 0x958   :  { %2185 = vsyncpa [#allocation16], 1 }
 0x959   :  { %2186 = vsyncpa [#allocation5], 1 }
 0x95a   :  { %2188 = vsyncpa [#allocation5 + $0x1], 1 }

</bundles_post_ra>
